<compile_context>
chip_gen: v7x
topology: tpu7x:2x2x1
jax: 0.10.0
libtpu: 0.0.40
codegen_flags: <defaults>
</compile_context>

<pallas_src>
import functools

import numpy as np
import jax
import jax.numpy as jnp
from jax.experimental import pallas as pl
from jax.experimental.pallas import tpu as pltpu

_VMEM_LIMIT = 64 * 1024 * 1024   # explicit scoped-VMEM limit (v5e default is 16 MiB)


# --------------------------------------------------------------------- helpers
def _pick_tile(total, preferred):
    """Largest multiple of 8 <= preferred that divides `total` (else full extent)."""
    if total % 8 != 0 or total <= preferred:
        return total
    t = (preferred // 8) * 8
    while t >= 8:
        if total % t == 0:
            return t
        t -= 8
    return total


def _compiler_params(semantics):
    return pltpu.CompilerParams(dimension_semantics=semantics,
                                vmem_limit_bytes=_VMEM_LIMIT)


# --------------------------------------------- projection: x -> value(bf16), om(f32)
def _proj_kernel(x_ref, wv_ref, bv_ref, wom_ref, bom_ref, val_ref, om_ref):
    xb = x_ref[...].astype(jnp.bfloat16)
    v = jnp.dot(xb, wv_ref[...], preferred_element_type=jnp.float32) + bv_ref[...]
    val_ref[...] = v.astype(jnp.bfloat16)
    om_ref[...] = (jnp.dot(xb, wom_ref[...],
                           preferred_element_type=jnp.float32) + bom_ref[...])


def _project(x2d, wv_b, bv, wom_b, bom, row_tile):
    R, C = x2d.shape
    Gom = wom_b.shape[1]
    TR = _pick_tile(R, row_tile)
    return pl.pallas_call(
        _proj_kernel,
        out_shape=(jax.ShapeDtypeStruct((R, C), jnp.bfloat16),
                   jax.ShapeDtypeStruct((R, Gom), jnp.float32)),
        grid=(R // TR,),
        in_specs=[pl.BlockSpec((TR, C), lambda i: (i, 0)),
                  pl.BlockSpec((C, C), lambda i: (0, 0)),
                  pl.BlockSpec((1, C), lambda i: (0, 0)),
                  pl.BlockSpec((C, Gom), lambda i: (0, 0)),
                  pl.BlockSpec((1, Gom), lambda i: (0, 0))],
        out_specs=(pl.BlockSpec((TR, C), lambda i: (i, 0)),
                   pl.BlockSpec((TR, Gom), lambda i: (i, 0))),
        compiler_params=_compiler_params(("parallel",)),
    )(x2d, wv_b, bv, wom_b, bom)


# ------------------------------------- BN+ReLU fused into the projection (DCN #2 in)
def _affine_relu_proj_kernel(x_ref, sc_ref, sh_ref, wv_ref, bv_ref, wom_ref, bom_ref,
                             val_ref, om_ref):
    xn = jnp.maximum(x_ref[...] * sc_ref[...] + sh_ref[...], 0.0).astype(jnp.bfloat16)
    v = jnp.dot(xn, wv_ref[...], preferred_element_type=jnp.float32) + bv_ref[...]
    val_ref[...] = v.astype(jnp.bfloat16)
    om_ref[...] = (jnp.dot(xn, wom_ref[...],
                           preferred_element_type=jnp.float32) + bom_ref[...])


def _affine_relu_project(x2d, scale, shift, wv_b, bv, wom_b, bom, row_tile):
    R, C = x2d.shape
    Gom = wom_b.shape[1]
    TR = _pick_tile(R, row_tile)
    return pl.pallas_call(
        _affine_relu_proj_kernel,
        out_shape=(jax.ShapeDtypeStruct((R, C), jnp.bfloat16),
                   jax.ShapeDtypeStruct((R, Gom), jnp.float32)),
        grid=(R // TR,),
        in_specs=[pl.BlockSpec((TR, C), lambda i: (i, 0)),
                  pl.BlockSpec((1, C), lambda i: (0, 0)),
                  pl.BlockSpec((1, C), lambda i: (0, 0)),
                  pl.BlockSpec((C, C), lambda i: (0, 0)),
                  pl.BlockSpec((1, C), lambda i: (0, 0)),
                  pl.BlockSpec((C, Gom), lambda i: (0, 0)),
                  pl.BlockSpec((1, Gom), lambda i: (0, 0))],
        out_specs=(pl.BlockSpec((TR, C), lambda i: (i, 0)),
                   pl.BlockSpec((TR, Gom), lambda i: (i, 0))),
        compiler_params=_compiler_params(("parallel",)),
    )(x2d, scale, shift, wv_b, bv, wom_b, bom)


# ----------------------------------------- BN + residual + 1x1 conv fused epilogue
def _affine_add_matmul_kernel(x_ref, sc_ref, sh_ref, r_ref, w_ref, o_ref):
    xn = (x_ref[...] * sc_ref[...] + sh_ref[...] + r_ref[...]).astype(jnp.bfloat16)
    o_ref[...] = jnp.dot(xn, w_ref[...], preferred_element_type=jnp.float32)


def _affine_add_matmul(x2d, scale, shift, res, w11_b, row_tile):
    R, C = x2d.shape
    Cout = w11_b.shape[1]
    TR = _pick_tile(R, row_tile)
    return pl.pallas_call(
        _affine_add_matmul_kernel,
        out_shape=jax.ShapeDtypeStruct((R, Cout), jnp.float32),
        grid=(R // TR,),
        in_specs=[pl.BlockSpec((TR, C), lambda i: (i, 0)),
                  pl.BlockSpec((1, C), lambda i: (0, 0)),
                  pl.BlockSpec((1, C), lambda i: (0, 0)),
                  pl.BlockSpec((TR, C), lambda i: (i, 0)),
                  pl.BlockSpec((C, Cout), lambda i: (0, 0))],
        out_specs=pl.BlockSpec((TR, Cout), lambda i: (i, 0)),
        compiler_params=_compiler_params(("parallel",)),
    )(x2d, scale, shift, res, w11_b)


def _bn_fold(s, q, gamma, beta, count, eps):
    # training-mode BN: biased variance; fold into per-channel scale/shift (tiny op).
    mean = s / count
    var = q / count - mean * mean
    scale = gamma * jax.lax.rsqrt(var + eps)
    shift = beta - mean * scale
    return scale, shift


# ------------------------------------------------------------ DCNv4 sampling kernel
def _dcn_sample_kernel(om_ref, val_ref, wo_ref, s_ref, bo_ref,
                       o_ref, ps_ref, pq_ref, *,
                       H, W, Ksz, K, Cg, OMD, stride, pad, dil, group,
                       offset_scale, TQ):
    C = o_ref.shape[-1]
    CgW = Cg * W
    qt = pl.program_id(1)

    # Hoisted base coordinates for this query tile (global pixel index = qt*TQ + row).
    pix = jax.lax.broadcasted_iota(jnp.int32, (TQ, 1), 0) + qt * TQ
    base_y = (pix // W).astype(jnp.float32) * float(stride) - float(pad)   # (TQ, 1)
    base_x = (pix % W).astype(jnp.float32) * float(stride) - float(pad)    # (TQ, 1)
    row_c = jax.lax.broadcasted_iota(jnp.int32, (1, H), 1).astype(jnp.float32)
    col_w = jax.lax.broadcasted_iota(jnp.int32, (1, W), 1).astype(jnp.float32)

    om = om_ref[...]                                              # (TQ, group*OMD)
    out = jnp.zeros((TQ, C), jnp.float32)
    for g in range(group):
        base = g * OMD
        # dx/dy/mask blocks sliced once per group as (TQ, K) slabs (contiguous).
        dxs = om[:, base:base + K]
        dys = om[:, base + K:base + 2 * K]
        mks = om[:, base + 2 * K:base + 3 * K]
        sy_all = base_y + dys * offset_scale                      # (TQ, K)
        sx_all = base_x + dxs * offset_scale                      # (TQ, K)

        val_g = val_ref[g]                                        # (H, Cg*W) bf16
        acc = jnp.zeros((TQ, CgW), jnp.float32)
        for k in range(K):
            ky, kx = k // Ksz, k % Ksz
            sy = sy_all[:, k:k + 1] + float(ky * dil)             # (TQ, 1)
            sx = sx_all[:, k:k + 1] + float(kx * dil)             # (TQ, 1)
            mk = mks[:, k:k + 1]                                  # (TQ, 1)
            # row hat-weights (mask folded in here on the narrow H lanes)
            wy = jnp.maximum(0.0, 1.0 - jnp.abs(sy - row_c)) * mk  # (TQ, H)
            # MXU: contract over input rows h
            part = jnp.dot(wy.astype(jnp.bfloat16), val_g,
                           preferred_element_type=jnp.float32)     # (TQ, Cg*W)
            # column hat-weights evaluated on W lanes, lane-replicated to Cg*W
            wxw = jnp.maximum(0.0, 1.0 - jnp.abs(sx - col_w))      # (TQ, W)
            acc = acc + part * jnp.tile(wxw, (1, Cg))              # (TQ, Cg*W)
        # W-reduce via tiny MXU dot with the block-sum matrix, then project with Wo.
        red = jnp.dot(acc.astype(jnp.bfloat16), s_ref[...],
                      preferred_element_type=jnp.float32)          # (TQ, Cg)
        out = out + jnp.dot(red.astype(jnp.bfloat16), wo_ref[g],
                            preferred_element_type=jnp.float32)    # (TQ, C)
    out = out + bo_ref[...]
    o_ref[...] = out
    # fused BN-statistics partials (finished on host) -- avoids re-reading y from HBM
    ps_ref[...] = jnp.sum(out, axis=0, keepdims=True)
    pq_ref[...] = jnp.sum(out * out, axis=0, keepdims=True)


def _dcn_sample(om2d, val_bf, *, N, H, W, C, Ksz, stride, pad, dil, group,
                offset_scale, wo_g, s_mat, bo, q_tile):
    """om2d: (N*H*W, Gom) f32; val_bf: (N*H*W, C) bf16 -> y (N*H*W, C) f32 + BN partials."""
    HW = H * W
    K = Ksz * Ksz
    Cg = C // group
    Gom = om2d.shape[-1]
    OMD = Gom // group

    # value laid out per group as (H, Cg*W), lanes c-major / w-minor (bf16 plumbing)
    val5 = (val_bf.reshape(N, H, W, group, Cg)
                  .transpose(0, 3, 1, 4, 2)
                  .reshape(N, group, H, Cg * W))
    om3 = om2d.reshape(N, HW, Gom)

    TQ = _pick_tile(HW, q_tile)
    nq = HW // TQ
    kernel = functools.partial(
        _dcn_sample_kernel, H=H, W=W, Ksz=Ksz, K=K, Cg=Cg, OMD=OMD, stride=stride,
        pad=pad, dil=dil, group=group, offset_scale=offset_scale, TQ=TQ)
    y, ps, pq = pl.pallas_call(
        kernel,
        out_shape=(jax.ShapeDtypeStruct((N, HW, C), jnp.float32),
                   jax.ShapeDtypeStruct((N, nq, 1, C), jnp.float32),
                   jax.ShapeDtypeStruct((N, nq, 1, C), jnp.float32)),
        grid=(N, nq),
        in_specs=[
            pl.BlockSpec((None, TQ, Gom), lambda n, q: (n, q, 0)),
            pl.BlockSpec((None, group, H, Cg * W), lambda n, q: (n, 0, 0, 0)),
            pl.BlockSpec((group, Cg, C), lambda n, q: (0, 0, 0)),
            pl.BlockSpec((Cg * W, Cg), lambda n, q: (0, 0)),
            pl.BlockSpec((1, C), lambda n, q: (0, 0)),
        ],
        out_specs=(pl.BlockSpec((None, TQ, C), lambda n, q: (n, q, 0)),
                   pl.BlockSpec((None, None, 1, C), lambda n, q: (n, q, 0, 0)),
                   pl.BlockSpec((None, None, 1, C), lambda n, q: (n, q, 0, 0))),
        compiler_params=_compiler_params(("parallel", "parallel")),
    )(om3, val5, wo_g, s_mat, bo)
    return y.reshape(N * HW, C), ps, pq


# ----------------------------------------------------------------- full forward
def rsdcnv4_forward(x_nchw, params, *, Ksz=3, stride=1, pad=1, dil=1, group=1,
                    offset_scale=1.0, eps=1e-5, q_tile=256, row_tile=512):
    # NOTE: like the PyTorch module, the block assumes the deformable conv keeps the
    # H*W token count (true for the default kernel_size=3, stride=1, padding=1).
    N, C, H, W = x_nchw.shape
    HW = H * W
    R = N * HW
    K = Ksz * Ksz

    wv, bv, wom, bom, wo, bo = params["dcnv4"]
    Gom = wom.shape[1]
    OMD = Gom // group
    Cg = C // group
    gamma, beta = params["bn_gamma"], params["bn_beta"]
    w11 = params["conv11_w"]

    # ---- derived / reordered weights (host-level layout plumbing, tiny) ----------
    # reorder Wom columns per group: interleaved (dx,dy) pairs -> [dx(K) | dy(K) | m(K)]
    perm = np.arange(Gom)
    for g in range(group):
        b0 = g * OMD
        for j in range(K):
            perm[b0 + j] = b0 + 2 * j
            perm[b0 + K + j] = b0 + 2 * j + 1
        # mask (and padding) columns keep their original positions
    perm = jnp.asarray(perm, dtype=jnp.int32)
    wom_r = jnp.take(wom, perm, axis=1)
    bom_r = jnp.take(bom, perm, axis=1)

    # bf16 MXU operands for every projection
    wv_b = wv.astype(jnp.bfloat16)
    wom_b = wom_r.astype(jnp.bfloat16)
    w11_b = w11.astype(jnp.bfloat16)
    wo_g = wo.reshape(group, Cg, C).astype(jnp.bfloat16)
    # block-sum matrix S[c*W + w, c] = 1  (reduces the W lanes on the MXU)
    s_mat = jnp.asarray(np.kron(np.eye(Cg, dtype=np.float32),
                                np.ones((W, 1), dtype=np.float32)), jnp.bfloat16)

    x2d = jnp.transpose(x_nchw, (0, 2, 3, 1)).reshape(R, C)
    shortcut = x2d   # channels match, so the PyTorch `if` branch never fires

    sample = functools.partial(
        _dcn_sample, N=N, H=H, W=W, C=C, Ksz=Ksz, stride=stride, pad=pad, dil=dil,
        group=group, offset_scale=offset_scale, wo_g=wo_g, s_mat=s_mat, bo=bo,
        q_tile=q_tile)

    # --- DCNv4 #1 -------------------------------------------------------------
    val1, om1 = _project(x2d, wv_b, bv, wom_b, bom_r, row_tile)
    y1, ps1, pq1 = sample(om1, val1)
    # --- BN -> ReLU folded into the second DCNv4 projection --------------------
    s1 = jnp.sum(ps1, axis=(0, 1))
    q1 = jnp.sum(pq1, axis=(0, 1))
    sc1, sh1 = _bn_fold(s1, q1, gamma, beta, R, eps)
    val2, om2 = _affine_relu_project(y1, sc1, sh1, wv_b, bv, wom_b, bom_r, row_tile)
    # --- DCNv4 #2 -------------------------------------------------------------
    y2, ps2, pq2 = sample(om2, val2)
    # --- BN -> +shortcut -> 1x1 conv fused epilogue -----------------------------
    s2 = jnp.sum(ps2, axis=(0, 1))
    q2 = jnp.sum(pq2, axis=(0, 1))
    sc2, sh2 = _bn_fold(s2, q2, gamma, beta, R, eps)
    out2d = _affine_add_matmul(y2, sc2, sh2, shortcut, w11_b, row_tile)

    Cout = w11.shape[1]
    return jnp.transpose(out2d.reshape(N, H, W, Cout), (0, 3, 1, 2))


# --------------------------------------------------------------------- parameters
def init_params(key, in_channels, out_channels, Ksz=3, group=1):
    K = Ksz * Ksz
    omd = ((3 * K + 7) // 8) * 8            # DCNv4 pads 3K up to a multiple of 8
    ks = jax.random.split(key, 8)
    scale = 0.1
    params = {
        "dcnv4": (
            scale * jax.random.normal(ks[0], (in_channels, in_channels), jnp.float32),
            scale * jax.random.normal(ks[1], (1, in_channels), jnp.float32),
            scale * jax.random.normal(ks[2], (in_channels, group * omd), jnp.float32),
            scale * jax.random.normal(ks[3], (1, group * omd), jnp.float32),
            scale * jax.random.normal(ks[4], (in_channels, in_channels), jnp.float32),
            scale * jax.random.normal(ks[5], (1, in_channels), jnp.float32),
        ),
        "bn_gamma": jnp.ones((1, in_channels), jnp.float32),   # PyTorch BN default init
        "bn_beta": jnp.zeros((1, in_channels), jnp.float32),
        # Conv2d weight (Cout, Cin, 1, 1) stored pre-transposed as (Cin, Cout); bias=False
        "conv11_w": scale * jax.random.normal(ks[6], (in_channels, out_channels),
                                              jnp.float32),
    }
    return params


if __name__ == "__main__":
    N, Cin, H, W = 2, 8, 16, 16
    Cout = 16

    key = jax.random.PRNGKey(0)
    kx, kp = jax.random.split(key)
    x = jax.random.normal(kx, (N, Cin, H, W), jnp.float32)
    params = init_params(kp, Cin, Cout, Ksz=3, group=1)

    out = rsdcnv4_forward(x, params, Ksz=3, stride=1, pad=1, dil=1, group=1)
    out = jax.block_until_ready(out)

    assert out.shape == (N, Cout, H, W), out.shape
    assert bool(jnp.all(jnp.isfinite(out)))
    print("KERNEL_OK")
</pallas_src>

<mosaic_0001>
module attributes {stable_mosaic.version = 11 : i64} {
  func.func @_proj_kernel(%arg0: i32, %arg1: memref<512x8xf32, #tpu.memory_space<vmem>>, %arg2: memref<8x8xbf16, #tpu.memory_space<vmem>>, %arg3: memref<1x8xf32, #tpu.memory_space<vmem>>, %arg4: memref<8x32xbf16, #tpu.memory_space<vmem>>, %arg5: memref<1x32xf32, #tpu.memory_space<vmem>>, %arg6: memref<512x8xbf16, #tpu.memory_space<vmem>>, %arg7: memref<512x32xf32, #tpu.memory_space<vmem>>) attributes {dimension_semantics = [#tpu.dimension_semantics<parallel>], iteration_bounds = array<i64: 1>, scalar_prefetch = 0 : i64, scratch_operands = 0 : i64, tpu.core_type = #tpu.core_type<tc>, window_params = [{transform_indices = @transform_0, window_bounds = array<i64: 512, 8>}, {pipeline_mode = #tpu.pipeline_mode<synchronous>, transform_indices = @transform_1, window_bounds = array<i64: 8, 8>}, {pipeline_mode = #tpu.pipeline_mode<synchronous>, transform_indices = @transform_2, window_bounds = array<i64: 1, 8>}, {pipeline_mode = #tpu.pipeline_mode<synchronous>, transform_indices = @transform_3, window_bounds = array<i64: 8, 32>}, {pipeline_mode = #tpu.pipeline_mode<synchronous>, transform_indices = @transform_4, window_bounds = array<i64: 1, 32>}, {transform_indices = @transform_5, window_bounds = array<i64: 512, 8>}, {transform_indices = @transform_6, window_bounds = array<i64: 512, 32>}]} {
    %c0 = arith.constant 0 : index
    %c0_0 = arith.constant 0 : index
    %0 = vector.load %arg1[%c0, %c0_0] : memref<512x8xf32, #tpu.memory_space<vmem>>, vector<512x8xf32>
    %1 = arith.truncf %0 : vector<512x8xf32> to vector<512x8xbf16>
    %c0_1 = arith.constant 0 : index
    %c0_2 = arith.constant 0 : index
    %2 = vector.load %arg2[%c0_1, %c0_2] : memref<8x8xbf16, #tpu.memory_space<vmem>>, vector<8x8xbf16>
    %cst = arith.constant dense<0.000000e+00> : vector<512x8xf32>
    %3 = tpu.matmul %1, %2, %cst {dimension_numbers = #tpu.dot_dimension_numbers<[1], [0], [0], [1], [0, 0, 1, 1], [], []>} : vector<512x8xbf16>, vector<8x8xbf16>, vector<512x8xf32> -> vector<512x8xf32>
    %c0_3 = arith.constant 0 : index
    %c0_4 = arith.constant 0 : index
    %4 = vector.load %arg3[%c0_3, %c0_4] : memref<1x8xf32, #tpu.memory_space<vmem>>, vector<1x8xf32>
    %5 = vector.broadcast %4 : vector<1x8xf32> to vector<512x8xf32>
    %6 = arith.addf %3, %5 : vector<512x8xf32>
    %7 = arith.truncf %6 : vector<512x8xf32> to vector<512x8xbf16>
    %c0_5 = arith.constant 0 : index
    %c0_6 = arith.constant 0 : index
    %8 = vector.load %arg6[%c0_5, %c0_6] : memref<512x8xbf16, #tpu.memory_space<vmem>>, vector<512x8xbf16>
    tpu.vector_store %arg6[%c0_5, %c0_6], %7 {strides = array<i32>} : memref<512x8xbf16, #tpu.memory_space<vmem>>, vector<512x8xbf16>,
    %c0_7 = arith.constant 0 : index
    %c0_8 = arith.constant 0 : index
    %9 = vector.load %arg4[%c0_7, %c0_8] : memref<8x32xbf16, #tpu.memory_space<vmem>>, vector<8x32xbf16>
    %cst_9 = arith.constant dense<0.000000e+00> : vector<512x32xf32>
    %10 = tpu.matmul %1, %9, %cst_9 {dimension_numbers = #tpu.dot_dimension_numbers<[1], [0], [0], [1], [0, 0, 1, 1], [], []>} : vector<512x8xbf16>, vector<8x32xbf16>, vector<512x32xf32> -> vector<512x32xf32>
    %c0_10 = arith.constant 0 : index
    %c0_11 = arith.constant 0 : index
    %11 = vector.load %arg5[%c0_10, %c0_11] : memref<1x32xf32, #tpu.memory_space<vmem>>, vector<1x32xf32>
    %12 = vector.broadcast %11 : vector<1x32xf32> to vector<512x32xf32>
    %13 = arith.addf %10, %12 : vector<512x32xf32>
    %c0_12 = arith.constant 0 : index
    %c0_13 = arith.constant 0 : index
    %14 = vector.load %arg7[%c0_12, %c0_13] : memref<512x32xf32, #tpu.memory_space<vmem>>, vector<512x32xf32>
    tpu.vector_store %arg7[%c0_12, %c0_13], %13 {strides = array<i32>} : memref<512x32xf32, #tpu.memory_space<vmem>>, vector<512x32xf32>,
    return
  }
  func.func @transform_0(%arg0: i32) -> (i32, i32) {
    %c0_i32 = arith.constant 0 : i32
    %c0_i32_0 = arith.constant 0 : i32
    return %arg0, %c0_i32 : i32, i32
  }
  func.func @transform_1(%arg0: i32) -> (i32, i32) {
    %c0_i32 = arith.constant 0 : i32
    %c0_i32_0 = arith.constant 0 : i32
    %c0_i32_1 = arith.constant 0 : i32
    return %c0_i32, %c0_i32_0 : i32, i32
  }
  func.func @transform_2(%arg0: i32) -> (i32, i32) {
    %c0_i32 = arith.constant 0 : i32
    %c0_i32_0 = arith.constant 0 : i32
    %c0_i32_1 = arith.constant 0 : i32
    return %c0_i32, %c0_i32_0 : i32, i32
  }
  func.func @transform_3(%arg0: i32) -> (i32, i32) {
    %c0_i32 = arith.constant 0 : i32
    %c0_i32_0 = arith.constant 0 : i32
    %c0_i32_1 = arith.constant 0 : i32
    return %c0_i32, %c0_i32_0 : i32, i32
  }
  func.func @transform_4(%arg0: i32) -> (i32, i32) {
    %c0_i32 = arith.constant 0 : i32
    %c0_i32_0 = arith.constant 0 : i32
    %c0_i32_1 = arith.constant 0 : i32
    return %c0_i32, %c0_i32_0 : i32, i32
  }
  func.func @transform_5(%arg0: i32) -> (i32, i32) {
    %c0_i32 = arith.constant 0 : i32
    %c0_i32_0 = arith.constant 0 : i32
    return %arg0, %c0_i32 : i32, i32
  }
  func.func @transform_6(%arg0: i32) -> (i32, i32) {
    %c0_i32 = arith.constant 0 : i32
    %c0_i32_0 = arith.constant 0 : i32
    return %arg0, %c0_i32 : i32, i32
  }
}

</mosaic_0001>

<bundles_post_ra>
// kernel: tpu_custom_call.1
= control target key start
LH: loop header
LB: loop body
LE: loop exit
PB: predicated region body
PF: predicated region fallthrough
CT: control target
= control target key end

     0   :  { %12 = vsyncpa [#allocation3], 0  ;;  %s2336_s0 = inlined_call_operand.hbm [shape: f32[512,8], index: 0, kind: input, shape index: {}]   ;;  %s2337_s1 = inlined_call_operand.hbm [shape: bf16[8,8], index: 1, kind: input, shape index: {}]   ;;  %s2338_s2 = inlined_call_operand.hbm [shape: f32[1,8], index: 2, kind: input, shape index: {}]   ;;  %s2339_s3 = inlined_call_operand.hbm [shape: bf16[8,32], index: 3, kind: input, shape index: {}]   ;;  %s2340_s4 = inlined_call_operand.hbm [shape: f32[1,32], index: 4, kind: input, shape index: {}]   ;;  %s2341_s5 = inlined_call_operand.hbm [shape: bf16[512,8], index: 5, kind: output, shape index: {0}]   ;;  %s2342_s6 = inlined_call_operand.hbm [shape: f32[512,32], index: 6, kind: output, shape index: {1}]  }
   0x1   :  { %13 = vsyncpa [#allocation6], 0 }
   0x2   :  { %14 = vsyncpa [#allocation9], 0 }
   0x3   :  { %15 = vsyncpa [#allocation4], 0 }
   0x4   :  { %16 = vsyncpa [#allocation13], 0  ;;  %s1869_s21 = smov [#allocation5]   ;;  %s1870_s23 = smov [#allocation8]  }
   0x5   :  { %s35_s22 = sshll.u32 %s1869_s21, 4  ;;  %s55_s24 = sshll.u32 %s1870_s23, 4  ;;  %s36_s22 = int_to_ptr.vmem [resolvable:$true] %s35_s22  ;;  %s56_s24 = int_to_ptr.vmem [resolvable:$true] %s55_s24 }
   0x6   :  { %s1705_s27 = scalar_lea.hbm %s2337_s1, 64 }
   0x7   :  { %p1706_p0 = scmp.ne.s32.totalorder %s2337_s1, %s1705_s27  ;;  %p1709_p1 = scmp.lt.u32.totalorder %s1705_s27, %s2337_s1 }
   0x9   :  { %p1711_p2 = pnand %p1709_p1, %p1706_p0 }
   0xb   :  { %1714 = shalt.err (!%p1711_p2)
}
   0xc   :  { %s1715_s8 = scalar_lea.vmem %s36_s22, 64  ;;  %p1720_p4 = scmp.lt.s32.totalorder %s36_s22, %s36_s22 }
   0xd   :  { %p1716_p3 = scmp.ne.s32.totalorder %s36_s22, %s1715_s8  ;;  %p1721_p5 = scmp.lt.s32.totalorder %s1715_s8, %s1715_s8 }
   0xf   :  { %p1722_p6 = por %p1721_p5, %p1720_p4 }
  0x11   :  { %p1723_p7 = pnand %p1722_p6, %p1716_p3 }
  0x13   :  { %1726 = shalt.err (!%p1723_p7)
}
  0x14   :  { %38 = dma.hbm_to_vmem [thread:$0]  %s2337_s1, 64, %s36_s22, [#allocation6]  }
  0x15   :  { %s1727_s13 = scalar_lea.hbm %s2339_s3, 64 }
  0x16   :  { %p1728_p8 = scmp.ne.s32.totalorder %s2339_s3, %s1727_s13  ;;  %p1731_p9 = scmp.lt.u32.totalorder %s1727_s13, %s2339_s3 }
  0x18   :  { %p1733_p10 = pnand %p1731_p9, %p1728_p8 }
  0x1a   :  { %1736 = shalt.err (!%p1733_p10)
}
  0x1b   :  { %s1737_s18 = scalar_lea.vmem %s56_s24, 64  ;;  %p1742_p12 = scmp.lt.s32.totalorder %s56_s24, %s56_s24 }
  0x1c   :  { %p1738_p11 = scmp.ne.s32.totalorder %s56_s24, %s1737_s18  ;;  %p1743_p13 = scmp.lt.s32.totalorder %s1737_s18, %s1737_s18 }
  0x1e   :  { %p1744_p0 = por %p1743_p13, %p1742_p12 }
  0x20   :  { %p1745_p1 = pnand %p1744_p0, %p1738_p11 }
  0x22   :  { %1748 = shalt.err (!%p1745_p1)
}
  0x23   :  { %58 = dma.hbm_to_vmem [thread:$0]  %s2339_s3, 64, %s56_s24, [#allocation9]  }
  0x24   :  { %s1871_s20 = smov [#allocation2]   ;;  %s1749_s25 = scalar_lea.hbm %s2336_s0, 8192 }
  0x25   :  { %s22_s21 = sshll.u32 %s1871_s20, 4  ;;  %p1750_p2 = scmp.ne.s32.totalorder %s2336_s0, %s1749_s25  ;;  %s23_s21 = int_to_ptr.vmem [resolvable:$true] %s22_s21 }
  0x26   :  { %p1753_p3 = scmp.lt.u32.totalorder %s1749_s25, %s2336_s0 }
  0x28   :  { %p1755_p4 = pnand %p1753_p3, %p1750_p2 }
  0x2a   :  { %1758 = shalt.err (!%p1755_p4)
}
  0x2b   :  { %s1759_s30 = scalar_lea.vmem %s23_s21, 8192  ;;  %p1764_p6 = scmp.lt.s32.totalorder %s23_s21, %s23_s21 }
  0x2c   :  { %p1760_p5 = scmp.ne.s32.totalorder %s23_s21, %s1759_s30  ;;  %p1765_p7 = scmp.lt.s32.totalorder %s1759_s30, %s1759_s30 }
  0x2e   :  { %p1766_p8 = por %p1765_p7, %p1764_p6 }
  0x30   :  { %p1767_p9 = pnand %p1766_p8, %p1760_p5 }
  0x32   :  { %1770 = shalt.err (!%p1767_p9)
}
  0x33   :  { %s1872_s3 = smov 128   ;;  %s1873_s24 = smov 8  }
  0x34   :  { %28 = dma.hbm_to_vmem [thread:$0]  %s2336_s0, 8192, %s23_s21, [#allocation3], %s1872_s3, %s1872_s3, %s1873_s24  }
  0x35   :  { %s1874_s9 = smov [#allocation7]   ;;  %s1875_s11 = smov [#allocation10]  }
  0x36   :  { %s45_s10 = sshll.u32 %s1874_s9, 4  ;;  %s65_s12 = sshll.u32 %s1875_s11, 4  ;;  %s46_s10 = int_to_ptr.vmem [resolvable:$true] %s45_s10  ;;  %s66_s12 = int_to_ptr.vmem [resolvable:$true] %s65_s12 }
  0x37   :  { %s1771_s15 = scalar_lea.hbm %s2338_s2, 16 }
  0x38   :  { %p1772_p10 = scmp.ne.s32.totalorder %s2338_s2, %s1771_s15  ;;  %p1775_p11 = scmp.lt.u32.totalorder %s1771_s15, %s2338_s2 }
  0x3a   :  { %p1777_p12 = pnand %p1775_p11, %p1772_p10 }
  0x3c   :  { %1780 = shalt.err (!%p1777_p12)
}
  0x3d   :  { %s1781_s0 = scalar_lea.vmem %s46_s10, 16  ;;  %s1785_s19 = scalar_lea.vmem %s46_s10, 32 }
  0x3e   :  { %p1782_p13 = scmp.ne.s32.totalorder %s46_s10, %s1781_s0  ;;  %p1786_p0 = scmp.lt.s32.totalorder %s46_s10, %s46_s10 }
  0x3f   :  { %p1787_p1 = scmp.lt.s32.totalorder %s1785_s19, %s1781_s0 }
  0x41   :  { %p1788_p2 = por %p1787_p1, %p1786_p0 }
  0x43   :  { %p1789_p3 = pnand %p1788_p2, %p1782_p13 }
  0x45   :  { %1792 = shalt.err (!%p1789_p3)
}
  0x46   :  { %48 = dma.hbm_to_vmem [thread:$0]  %s2338_s2, 16, %s46_s10, [#allocation6]  }
  0x47   :  { %s1793_s25 = scalar_lea.hbm %s2340_s4, 16 }
  0x48   :  { %p1794_p4 = scmp.ne.s32.totalorder %s2340_s4, %s1793_s25  ;;  %p1797_p5 = scmp.lt.u32.totalorder %s1793_s25, %s2340_s4 }
  0x4a   :  { %p1799_p6 = pnand %p1797_p5, %p1794_p4 }
  0x4c   :  { %1802 = shalt.err (!%p1799_p6)
}
  0x4d   :  { %s1803_s30 = scalar_lea.vmem %s66_s12, 16  ;;  %s1807_s7 = scalar_lea.vmem %s66_s12, 32 }
  0x4e   :  { %p1804_p7 = scmp.ne.s32.totalorder %s66_s12, %s1803_s30  ;;  %p1808_p8 = scmp.lt.s32.totalorder %s66_s12, %s66_s12 }
  0x4f   :  { %p1809_p9 = scmp.lt.s32.totalorder %s1807_s7, %s1803_s30 }
  0x51   :  { %p1810_p10 = por %p1809_p9, %p1808_p8 }
  0x53   :  { %p1811_p11 = pnand %p1810_p10, %p1804_p7 }
  0x55   :  { %1814 = shalt.err (!%p1811_p11)
}
  0x56   :  { %68 = dma.hbm_to_vmem [thread:$0]  %s2340_s4, 16, %s66_s12, [#allocation9]  }
  0x57   :  { %1859 = dma.done.wait [#allocation3], 8192  }
  0x58   :  { %1860 = vsyncadd [#allocation3], 4294959104 }
  0x59   :  { %1861 = dma.done.wait [#allocation6], 80  }
  0x5a   :  { %1862 = vsyncadd [#allocation6], 4294967216 }
  0x5b   :  { %1863 = dma.done.wait [#allocation9], 80  }
  0x5c   :  { %1864 = vsyncadd [#allocation9], 4294967216  ;;  %vm286_vm0 = vcmask 1043456   ;;  %v181_v0 = vld [vmem:[#allocation5] sm:$0xf]  ;;  %v86_v5 = vld [vmem:[#allocation2 + $0x8] sm:$0xff] }
  0x5d   :  { %v900_v1 = vld [vmem:[#allocation8] sm:$0xf]  ;;  %1692 = vmatprep.subr.msk.bf16.mxu0 %vm286_vm0, %v181_v0  ;;  %v288_v3 = vsel %vm286_vm0, %v181_v0, 0  ;;  %vm189_vm1 = vcmask 64512   ;;  %v87_v6 = vld [vmem:[#allocation2 + $0x10] sm:$0xff]  ;;  %v88_v7 = vld [vmem:[#allocation2 + $0x18] sm:$0xff] }
  0x5e   :  { %v85_v2 = vld [vmem:[#allocation2] sm:$0xff]  ;;  %1693 = vmatprep.subr.msk.bf16.mxu1 %vm286_vm0, %v900_v1  ;;  %v909_v4 = vsel %vm286_vm0, %v900_v1, 0  ;;  %1561 = vmatpush3.bf16.msra.mxu0 %v288_v3  ;;  %v150_v9 = vpack.c.bf16 %v88_v7, %v87_v6  ;;  %v90_v11 = vld [vmem:[#allocation2 + $0x28] sm:$0xff]  ;;  %v91_v13 = vld [vmem:[#allocation2 + $0x30] sm:$0xff]  ;;  %vm1200_vm2 = vcmask 261120   ;;  %vm835_vm3 = vcmask 60416  }
  0x5f   :  { %1627 = vmatpush3.bf16.msra.mxu1 %v909_v4  ;;  %v149_v8 = vpack.c.bf16 %v86_v5, %v85_v2  ;;  %v89_v10 = vld [vmem:[#allocation2 + $0x20] sm:$0xff]  ;;  %v92_v14 = vld [vmem:[#allocation2 + $0x38] sm:$0xff]  ;;  %v94_v16 = vld [vmem:[#allocation2 + $0x48] sm:$0xff]  ;;  %s1876_s4 = smov [#allocation12]   ;;  %s1877_s10 = smov [#allocation11]  }
  0x60   :  { %v151_v12 = vpack.c.bf16 %v90_v11, %v89_v10  ;;  %v93_v15 = vld [vmem:[#allocation2 + $0x40] sm:$0xff]  ;;  %v152_v17 = vpack.c.bf16 %v92_v14, %v91_v13  ;;  %v95_v19 = vld [vmem:[#allocation2 + $0x50] sm:$0xff]  ;;  %v96_v20 = vld [vmem:[#allocation2 + $0x58] sm:$0xff]  ;;  %s1282_s9 = sshll.u32 %s1876_s4, 4  ;;  %s1270_s11 = sshll.u32 %s1877_s10, 4  ;;  %s1283_s9 = int_to_ptr.vmem [resolvable:$true] %s1282_s9  ;;  %s2298_s11 = int_to_ptr.vmem [resolvable:$true] %s1270_s11 }
  0x61   :  { %1562 = vmatprep.mubr.msk.bf16.mxu0 %vm189_vm1, %v149_v8  ;;  %1628 = vmatprep.mubr.msk.bf16.mxu1 %vm189_vm1, %v149_v8  ;;  %v153_v18 = vpack.c.bf16 %v94_v16, %v93_v15  ;;  %v97_v21 = vld [vmem:[#allocation2 + $0x60] sm:$0xff]  ;;  %v98_v22 = vld [vmem:[#allocation2 + $0x68] sm:$0xff]  ;;  %v154_v23 = vpack.c.bf16 %v96_v20, %v95_v19  ;;  %v99_v25 = vld [vmem:[#allocation2 + $0x70] sm:$0xff]  ;;  %s1815_s12 = scalar_lea.vmem %s1283_s9, 8192  ;;  %p1820_p13 = scmp.lt.s32.totalorder %s1283_s9, %s1283_s9 }
  0x62   :  { %1563 = vmatmul.mubr.msk.bf16.vlgmr.msra.gmra.mrb[0].mxu0 %vm189_vm1, %v150_v9  ;;  %1629 = vmatmul.mubr.msk.bf16.vlgmr.msra.gmra.mrb[0].mxu1 %vm189_vm1, %v150_v9  ;;  %v155_v24 = vpack.c.bf16 %v98_v22, %v97_v21  ;;  %v100_v26 = vld [vmem:[#allocation2 + $0x78] sm:$0xff]  ;;  %v101_v27 = vld [vmem:[#allocation2 + $0x80] sm:$0xff]  ;;  %v102_v28 = vld [vmem:[#allocation2 + $0x88] sm:$0xff]  ;;  %p1816_p12 = scmp.ne.s32.totalorder %s1283_s9, %s1815_s12  ;;  %p1821_p0 = scmp.lt.s32.totalorder %s1815_s12, %s1815_s12 }
  0x63   :  { %1566 = vmatprep.mubr.msk.bf16.mxu0 %vm189_vm1, %v151_v12  ;;  %1632 = vmatprep.mubr.msk.bf16.mxu1 %vm189_vm1, %v151_v12  ;;  %v156_v29 = vpack.c.bf16 %v100_v26, %v99_v25  ;;  %v157_v30 = vpack.c.bf16 %v102_v28, %v101_v27  ;;  %v103_v31 = vld [vmem:[#allocation2 + $0x90] sm:$0xff]  ;;  %v104_v32 = vld [vmem:[#allocation2 + $0x98] sm:$0xff]  ;;  %v105_v33 = vld [vmem:[#allocation2 + $0xa0] sm:$0xff] }
  0x64   :  { %v106_v34 = vld [vmem:[#allocation2 + $0xa8] sm:$0xff]  ;;  %v158_v35 = vpack.c.bf16 %v104_v32, %v103_v31  ;;  %v107_v37 = vld [vmem:[#allocation2 + $0xb0] sm:$0xff]  ;;  %v108_v38 = vld [vmem:[#allocation2 + $0xb8] sm:$0xff]  ;;  %p1822_p1 = por %p1821_p0, %p1820_p13 }
  0x65   :  { %v159_v36 = vpack.c.bf16 %v106_v34, %v105_v33  ;;  %v109_v39 = vld [vmem:[#allocation2 + $0xc0] sm:$0xff]  ;;  %v110_v40 = vld [vmem:[#allocation2 + $0xc8] sm:$0xff]  ;;  %v160_v41 = vpack.c.bf16 %v108_v38, %v107_v37  ;;  %v111_v43 = vld [vmem:[#allocation2 + $0xd0] sm:$0xff] }
  0x66   :  { %v161_v42 = vpack.c.bf16 %v110_v40, %v109_v39  ;;  %v112_v44 = vld [vmem:[#allocation2 + $0xd8] sm:$0xff]  ;;  %v113_v45 = vld [vmem:[#allocation2 + $0xe0] sm:$0xff]  ;;  %v114_v46 = vld [vmem:[#allocation2 + $0xe8] sm:$0xff]  ;;  %p1823_p2 = pnand %p1822_p1, %p1816_p12 }
  0x67   :  { %v162_v47 = vpack.c.bf16 %v112_v44, %v111_v43  ;;  %v163_v48 = vpack.c.bf16 %v114_v46, %v113_v45  ;;  %v115_v49 = vld [vmem:[#allocation2 + $0xf0] sm:$0xff]  ;;  %v116_v50 = vld [vmem:[#allocation2 + $0xf8] sm:$0xff]  ;;  %v117_v51 = vld [vmem:[#allocation2 + $0x100] sm:$0xff] }
  0x68   :  { %v118_v52 = vld [vmem:[#allocation2 + $0x108] sm:$0xff]  ;;  %v164_v53 = vpack.c.bf16 %v116_v50, %v115_v49  ;;  %v119_v55 = vld [vmem:[#allocation2 + $0x110] sm:$0xff]  ;;  %v120_v56 = vld [vmem:[#allocation2 + $0x118] sm:$0xff] }
  0x69   :  { %v165_v54 = vpack.c.bf16 %v118_v52, %v117_v51  ;;  %v121_v57 = vld [vmem:[#allocation2 + $0x120] sm:$0xff]  ;;  %v122_v58 = vld [vmem:[#allocation2 + $0x128] sm:$0xff]  ;;  %v166_v59 = vpack.c.bf16 %v120_v56, %v119_v55  ;;  %v123_v61 = vld [vmem:[#allocation2 + $0x130] sm:$0xff] }
  0x6a   :  { %1567 = vmatmul.mubr.msk.bf16.gmra.mrb[4].mxu0 %vm189_vm1, %v152_v17  ;;  %1633 = vmatmul.mubr.msk.bf16.gmra.mrb[4].mxu1 %vm189_vm1, %v152_v17  ;;  %v167_v60 = vpack.c.bf16 %v122_v58, %v121_v57  ;;  %v124_v62 = vld [vmem:[#allocation2 + $0x138] sm:$0xff]  ;;  %v125_v63 = vld [vmem:[#allocation2 + $0x140] sm:$0xff]  ;;  %v126_v0 = vld [vmem:[#allocation2 + $0x148] sm:$0xff] }
  0x6b   :  { %1570 = vmatprep.mubr.msk.bf16.mxu0 %vm189_vm1, %v153_v18  ;;  %1636 = vmatprep.mubr.msk.bf16.mxu1 %vm189_vm1, %v153_v18  ;;  %v168_v1 = vpack.c.bf16 %v124_v62, %v123_v61  ;;  %v169_v2 = vpack.c.bf16 %v126_v0, %v125_v63  ;;  %v127_v3 = vld [vmem:[#allocation2 + $0x150] sm:$0xff]  ;;  %v128_v4 = vld [vmem:[#allocation2 + $0x158] sm:$0xff]  ;;  %v129_v5 = vld [vmem:[#allocation2 + $0x160] sm:$0xff] }
  0x6c   :  { %v130_v6 = vld [vmem:[#allocation2 + $0x168] sm:$0xff]  ;;  %v170_v7 = vpack.c.bf16 %v128_v4, %v127_v3  ;;  %v131_v9 = vld [vmem:[#allocation2 + $0x170] sm:$0xff]  ;;  %v132_v10 = vld [vmem:[#allocation2 + $0x178] sm:$0xff] }
  0x6d   :  { %v171_v8 = vpack.c.bf16 %v130_v6, %v129_v5  ;;  %v133_v11 = vld [vmem:[#allocation2 + $0x180] sm:$0xff]  ;;  %v134_v12 = vld [vmem:[#allocation2 + $0x188] sm:$0xff]  ;;  %v172_v13 = vpack.c.bf16 %v132_v10, %v131_v9  ;;  %v135_v15 = vld [vmem:[#allocation2 + $0x190] sm:$0xff] }
  0x6e   :  { %v173_v14 = vpack.c.bf16 %v134_v12, %v133_v11  ;;  %v136_v16 = vld [vmem:[#allocation2 + $0x198] sm:$0xff]  ;;  %v137_v17 = vld [vmem:[#allocation2 + $0x1a0] sm:$0xff]  ;;  %v138_v18 = vld [vmem:[#allocation2 + $0x1a8] sm:$0xff] }
  0x6f   :  { %v174_v19 = vpack.c.bf16 %v136_v16, %v135_v15  ;;  %v175_v20 = vpack.c.bf16 %v138_v18, %v137_v17  ;;  %v139_v21 = vld [vmem:[#allocation2 + $0x1b0] sm:$0xff]  ;;  %v140_v22 = vld [vmem:[#allocation2 + $0x1b8] sm:$0xff]  ;;  %v2044_v37 = vld [vmem:[#allocation10] ss:$0 sm:$0xff] }
  0x70   :  { %v176_v25 = vpack.c.bf16 %v140_v22, %v139_v21  ;;  %v143_v27 = vld [vmem:[#allocation2 + $0x1d0] sm:$0xff]  ;;  %v144_v28 = vld [vmem:[#allocation2 + $0x1d8] sm:$0xff] }
  0x71   :  { %v178_v31 = vpack.c.bf16 %v144_v28, %v143_v27  ;;  %v147_v33 = vld [vmem:[#allocation2 + $0x1f0] sm:$0xff]  ;;  %v148_v34 = vld [vmem:[#allocation2 + $0x1f8] sm:$0xff] }
  0x72   :  { %1571 = vmatmul.mubr.msk.bf16.gmra.mrb[8].mxu0 %vm189_vm1, %v154_v23  ;;  %1637 = vmatmul.mubr.msk.bf16.gmra.mrb[8].mxu1 %vm189_vm1, %v154_v23  ;;  %v141_v23 = vld [vmem:[#allocation2 + $0x1c0] sm:$0xff] }
  0x73   :  { %1574 = vmatprep.mubr.msk.bf16.mxu0 %vm189_vm1, %v155_v24  ;;  %1640 = vmatprep.mubr.msk.bf16.mxu1 %vm189_vm1, %v155_v24  ;;  %v142_v24 = vld [vmem:[#allocation2 + $0x1c8] sm:$0xff] }
  0x74   :  { %v177_v26 = vpack.c.bf16 %v142_v24, %v141_v23 }
  0x7a   :  { %1575 = vmatmul.mubr.msk.bf16.gmra.mrb[12].mxu0 %vm189_vm1, %v156_v29  ;;  %1641 = vmatmul.mubr.msk.bf16.gmra.mrb[12].mxu1 %vm189_vm1, %v156_v29  ;;  %v145_v29 = vld [vmem:[#allocation2 + $0x1e0] sm:$0xff] }
  0x7b   :  { %1578 = vmatprep.mubr.msk.bf16.mxu0 %vm189_vm1, %v157_v30  ;;  %1644 = vmatprep.mubr.msk.bf16.mxu1 %vm189_vm1, %v157_v30  ;;  %v146_v30 = vld [vmem:[#allocation2 + $0x1e8] sm:$0xff] }
  0x7c   :  { %v179_v32 = vpack.c.bf16 %v146_v30, %v145_v29 }
  0x82   :  { %1579 = vmatmul.mubr.msk.bf16.gmra.mrb[16].mxu0 %vm189_vm1, %v158_v35  ;;  %1645 = vmatmul.mubr.msk.bf16.gmra.mrb[16].mxu1 %vm189_vm1, %v158_v35  ;;  %v180_v35 = vpack.c.bf16 %v148_v34, %v147_v33 }
  0x83   :  { %1582 = vmatprep.mubr.msk.bf16.mxu0 %vm189_vm1, %v159_v36  ;;  %1648 = vmatprep.mubr.msk.bf16.mxu1 %vm189_vm1, %v159_v36  ;;  %v2042_v36 = vld [vmem:[#allocation7] ss:$0 sm:$0xff] }
  0x8a   :  { %1583 = vmatmul.mubr.msk.bf16.gmra.mrb[20].mxu0 %vm189_vm1, %v160_v41  ;;  %1649 = vmatmul.mubr.msk.bf16.gmra.mrb[20].mxu1 %vm189_vm1, %v160_v41 }
  0x8b   :  { %1586 = vmatprep.mubr.msk.bf16.mxu0 %vm189_vm1, %v161_v42  ;;  %1652 = vmatprep.mubr.msk.bf16.mxu1 %vm189_vm1, %v161_v42 }
  0x92   :  { %1587 = vmatmul.mubr.msk.bf16.gmra.mrb[24].mxu0 %vm189_vm1, %v162_v47  ;;  %1653 = vmatmul.mubr.msk.bf16.gmra.mrb[24].mxu1 %vm189_vm1, %v162_v47 }
  0x93   :  { %1590 = vmatprep.mubr.msk.bf16.mxu0 %vm189_vm1, %v163_v48  ;;  %1656 = vmatprep.mubr.msk.bf16.mxu1 %vm189_vm1, %v163_v48 }
  0x9a   :  { %1591 = vmatmul.mubr.msk.bf16.gmra.mrb[28].mxu0 %vm189_vm1, %v164_v53  ;;  %1657 = vmatmul.mubr.msk.bf16.gmra.mrb[28].mxu1 %vm189_vm1, %v164_v53 }
  0x9b   :  { %1594 = vmatprep.mubr.msk.bf16.mxu0 %vm189_vm1, %v165_v54  ;;  %1660 = vmatprep.mubr.msk.bf16.mxu1 %vm189_vm1, %v165_v54 }
  0xa2   :  { %1595 = vmatmul.mubr.msk.bf16.gmra.mrb[32].mxu0 %vm189_vm1, %v166_v59  ;;  %1661 = vmatmul.mubr.msk.bf16.gmra.mrb[32].mxu1 %vm189_vm1, %v166_v59 }
  0xa3   :  { %1598 = vmatprep.mubr.msk.bf16.mxu0 %vm189_vm1, %v167_v60  ;;  %1664 = vmatprep.mubr.msk.bf16.mxu1 %vm189_vm1, %v167_v60 }
  0xaa   :  { %1599 = vmatmul.mubr.msk.bf16.gmra.mrb[36].mxu0 %vm189_vm1, %v168_v1  ;;  %1665 = vmatmul.mubr.msk.bf16.gmra.mrb[36].mxu1 %vm189_vm1, %v168_v1 }
  0xab   :  { %1602 = vmatprep.mubr.msk.bf16.mxu0 %vm189_vm1, %v169_v2  ;;  %1668 = vmatprep.mubr.msk.bf16.mxu1 %vm189_vm1, %v169_v2 }
  0xb2   :  { %1603 = vmatmul.mubr.msk.bf16.gmra.mrb[40].mxu0 %vm189_vm1, %v170_v7  ;;  %1669 = vmatmul.mubr.msk.bf16.gmra.mrb[40].mxu1 %vm189_vm1, %v170_v7 }
  0xb3   :  { %1606 = vmatprep.mubr.msk.bf16.mxu0 %vm189_vm1, %v171_v8  ;;  %1672 = vmatprep.mubr.msk.bf16.mxu1 %vm189_vm1, %v171_v8 }
  0xba   :  { %1607 = vmatmul.mubr.msk.bf16.gmra.mrb[44].mxu0 %vm189_vm1, %v172_v13  ;;  %1673 = vmatmul.mubr.msk.bf16.gmra.mrb[44].mxu1 %vm189_vm1, %v172_v13 }
  0xbb   :  { %1610 = vmatprep.mubr.msk.bf16.mxu0 %vm189_vm1, %v173_v14  ;;  %1676 = vmatprep.mubr.msk.bf16.mxu1 %vm189_vm1, %v173_v14 }
  0xc2   :  { %1611 = vmatmul.mubr.msk.bf16.gmra.mrb[48].mxu0 %vm189_vm1, %v174_v19  ;;  %1677 = vmatmul.mubr.msk.bf16.gmra.mrb[48].mxu1 %vm189_vm1, %v174_v19 }
  0xc3   :  { %1614 = vmatprep.mubr.msk.bf16.mxu0 %vm189_vm1, %v175_v20  ;;  %1680 = vmatprep.mubr.msk.bf16.mxu1 %vm189_vm1, %v175_v20 }
  0xca   :  { %1615 = vmatmul.mubr.msk.bf16.gmra.mrb[52].mxu0 %vm189_vm1, %v176_v25  ;;  %1681 = vmatmul.mubr.msk.bf16.gmra.mrb[52].mxu1 %vm189_vm1, %v176_v25 }
  0xcb   :  { %1618 = vmatprep.mubr.msk.bf16.mxu0 %vm189_vm1, %v177_v26  ;;  %1684 = vmatprep.mubr.msk.bf16.mxu1 %vm189_vm1, %v177_v26 }
  0xd2   :  { %1619 = vmatmul.mubr.msk.bf16.gmra.mrb[56].mxu0 %vm189_vm1, %v178_v31  ;;  %1685 = vmatmul.mubr.msk.bf16.gmra.mrb[56].mxu1 %vm189_vm1, %v178_v31 }
  0xd3   :  { %1622 = vmatprep.mubr.msk.bf16.mxu0 %vm189_vm1, %v179_v32  ;;  %1688 = vmatprep.mubr.msk.bf16.mxu1 %vm189_vm1, %v179_v32 }
  0xda   :  { %1623 = vmatmul.mubr.msk.bf16.gmra.mrb[60].mxu0 %vm189_vm1, %v180_v35  ;;  %1689 = vmatmul.mubr.msk.bf16.gmra.mrb[60].mxu1 %vm189_vm1, %v180_v35 }
 0x135   :  { %v1564_v38 = vpop.f32.mrb[0].mxu0  ;;  %v1630_v39 = vpop.f32.mrb[0].mxu1 }
 0x136   :  { %v333_v40 = vadd.f32 %v1564_v38, %v2042_v36  ;;  %v954_v41 = vadd.f32 %v1630_v39, %v2044_v37  ;;  %v324_v42 = vpop.f32.mrb[1].mxu0  ;;  %v945_v43 = vpop.f32.mrb[1].mxu1 }
 0x137   :  { %v325_v44 = vadd.f32 %v2042_v36, %v324_v42  ;;  %v946_v45 = vadd.f32 %v2044_v37, %v945_v43  ;;  %v1565_v46 = vpop.f32.mrb[2].mxu0  ;;  %v1631_v47 = vpop.f32.mrb[2].mxu1 }
 0x138   :  { %v1432_v48 = vpack.c.bf16 %v333_v40, %v333_v40  ;;  %1203 = vst.msk [vmem:[#allocation12 + $0x10] sm:$0xff] %vm1200_vm2, %v954_v41  ;;  %v336_v49 = vadd.f32 %v1565_v46, %v2042_v36  ;;  %v957_v50 = vadd.f32 %v1631_v47, %v2044_v37  ;;  %v327_v51 = vpop.f32.mrb[3].mxu0  ;;  %v948_v52 = vpop.f32.mrb[3].mxu1 }
 0x139   :  { %v1430_v53 = vpack.c.bf16 %v325_v44, %v325_v44  ;;  %1201 = vst.msk [vmem:[#allocation12] sm:$0xff] %vm1200_vm2, %v946_v45  ;;  %v328_v54 = vadd.f32 %v2042_v36, %v327_v51  ;;  %v949_v55 = vadd.f32 %v2044_v37, %v948_v52 }
 0x13a   :  { %838 = vst.msk [vmem:[#allocation11 + $0x8] sm:$0xf] %vm835_vm3, %v1432_v48  ;;  %v1433_v56 = vpack.c.bf16 %v336_v49, %v336_v49 }
 0x13b   :  { %1204 = vst.msk [vmem:[#allocation12 + $0x18] sm:$0xff] %vm1200_vm2, %v957_v50  ;;  %v1431_v57 = vpack.c.bf16 %v328_v54, %v328_v54  ;;  %1202 = vst.msk [vmem:[#allocation12 + $0x8] sm:$0xff] %vm1200_vm2, %v949_v55 }
 0x13c   :  { %836 = vst.msk [vmem:[#allocation11] sm:$0xf] %vm835_vm3, %v1430_v53  ;;  %839 = vst.msk [vmem:[#allocation11 + $0xc] sm:$0xf] %vm835_vm3, %v1433_v56 }
 0x13d   :  { %837 = vst.msk [vmem:[#allocation11 + $0x4] sm:$0xf] %vm835_vm3, %v1431_v57  ;;  %v1568_v58 = vpop.f32.mrb[4].mxu0  ;;  %v1634_v59 = vpop.f32.mrb[4].mxu1 }
 0x13e   :  { %v349_v60 = vadd.f32 %v1568_v58, %v2042_v36  ;;  %v970_v61 = vadd.f32 %v1634_v59, %v2044_v37  ;;  %v340_v62 = vpop.f32.mrb[5].mxu0  ;;  %v961_v63 = vpop.f32.mrb[5].mxu1 }
 0x13f   :  { %v341_v0 = vadd.f32 %v2042_v36, %v340_v62  ;;  %v962_v1 = vadd.f32 %v2044_v37, %v961_v63  ;;  %v1569_v2 = vpop.f32.mrb[6].mxu0  ;;  %v1635_v3 = vpop.f32.mrb[6].mxu1 }
 0x140   :  { %v1436_v4 = vpack.c.bf16 %v349_v60, %v349_v60  ;;  %1207 = vst.msk [vmem:[#allocation12 + $0x30] sm:$0xff] %vm1200_vm2, %v970_v61  ;;  %v352_v5 = vadd.f32 %v1569_v2, %v2042_v36  ;;  %v973_v6 = vadd.f32 %v1635_v3, %v2044_v37  ;;  %v343_v7 = vpop.f32.mrb[7].mxu0  ;;  %v964_v8 = vpop.f32.mrb[7].mxu1 }
 0x141   :  { %v1434_v9 = vpack.c.bf16 %v341_v0, %v341_v0  ;;  %1205 = vst.msk [vmem:[#allocation12 + $0x20] sm:$0xff] %vm1200_vm2, %v962_v1  ;;  %v344_v10 = vadd.f32 %v2042_v36, %v343_v7  ;;  %v965_v11 = vadd.f32 %v2044_v37, %v964_v8 }
 0x142   :  { %842 = vst.msk [vmem:[#allocation11 + $0x18] sm:$0xf] %vm835_vm3, %v1436_v4  ;;  %v1437_v12 = vpack.c.bf16 %v352_v5, %v352_v5 }
 0x143   :  { %1208 = vst.msk [vmem:[#allocation12 + $0x38] sm:$0xff] %vm1200_vm2, %v973_v6  ;;  %v1435_v13 = vpack.c.bf16 %v344_v10, %v344_v10  ;;  %1206 = vst.msk [vmem:[#allocation12 + $0x28] sm:$0xff] %vm1200_vm2, %v965_v11 }
 0x144   :  { %840 = vst.msk [vmem:[#allocation11 + $0x10] sm:$0xf] %vm835_vm3, %v1434_v9  ;;  %843 = vst.msk [vmem:[#allocation11 + $0x1c] sm:$0xf] %vm835_vm3, %v1437_v12 }
 0x145   :  { %841 = vst.msk [vmem:[#allocation11 + $0x14] sm:$0xf] %vm835_vm3, %v1435_v13  ;;  %v1572_v14 = vpop.f32.mrb[8].mxu0  ;;  %v1638_v15 = vpop.f32.mrb[8].mxu1 }
 0x146   :  { %v365_v16 = vadd.f32 %v1572_v14, %v2042_v36  ;;  %v986_v17 = vadd.f32 %v1638_v15, %v2044_v37  ;;  %v356_v18 = vpop.f32.mrb[9].mxu0  ;;  %v977_v19 = vpop.f32.mrb[9].mxu1 }
 0x147   :  { %v357_v20 = vadd.f32 %v2042_v36, %v356_v18  ;;  %v978_v21 = vadd.f32 %v2044_v37, %v977_v19  ;;  %v1573_v22 = vpop.f32.mrb[10].mxu0  ;;  %v1639_v23 = vpop.f32.mrb[10].mxu1 }
 0x148   :  { %v1440_v24 = vpack.c.bf16 %v365_v16, %v365_v16  ;;  %1211 = vst.msk [vmem:[#allocation12 + $0x50] sm:$0xff] %vm1200_vm2, %v986_v17  ;;  %v368_v25 = vadd.f32 %v1573_v22, %v2042_v36  ;;  %v989_v26 = vadd.f32 %v1639_v23, %v2044_v37  ;;  %v359_v27 = vpop.f32.mrb[11].mxu0  ;;  %v980_v28 = vpop.f32.mrb[11].mxu1 }
 0x149   :  { %v1438_v29 = vpack.c.bf16 %v357_v20, %v357_v20  ;;  %1209 = vst.msk [vmem:[#allocation12 + $0x40] sm:$0xff] %vm1200_vm2, %v978_v21  ;;  %v360_v30 = vadd.f32 %v2042_v36, %v359_v27  ;;  %v981_v31 = vadd.f32 %v2044_v37, %v980_v28 }
 0x14a   :  { %846 = vst.msk [vmem:[#allocation11 + $0x28] sm:$0xf] %vm835_vm3, %v1440_v24  ;;  %v1441_v32 = vpack.c.bf16 %v368_v25, %v368_v25 }
 0x14b   :  { %1212 = vst.msk [vmem:[#allocation12 + $0x58] sm:$0xff] %vm1200_vm2, %v989_v26  ;;  %v1439_v33 = vpack.c.bf16 %v360_v30, %v360_v30  ;;  %1210 = vst.msk [vmem:[#allocation12 + $0x48] sm:$0xff] %vm1200_vm2, %v981_v31 }
 0x14c   :  { %844 = vst.msk [vmem:[#allocation11 + $0x20] sm:$0xf] %vm835_vm3, %v1438_v29  ;;  %847 = vst.msk [vmem:[#allocation11 + $0x2c] sm:$0xf] %vm835_vm3, %v1441_v32 }
 0x14d   :  { %845 = vst.msk [vmem:[#allocation11 + $0x24] sm:$0xf] %vm835_vm3, %v1439_v33  ;;  %v1576_v34 = vpop.f32.mrb[12].mxu0  ;;  %v1642_v35 = vpop.f32.mrb[12].mxu1 }
 0x14e   :  { %v381_v38 = vadd.f32 %v1576_v34, %v2042_v36  ;;  %v1002_v39 = vadd.f32 %v1642_v35, %v2044_v37  ;;  %v372_v40 = vpop.f32.mrb[13].mxu0  ;;  %v993_v41 = vpop.f32.mrb[13].mxu1 }
 0x14f   :  { %v373_v42 = vadd.f32 %v2042_v36, %v372_v40  ;;  %v994_v43 = vadd.f32 %v2044_v37, %v993_v41  ;;  %v1577_v44 = vpop.f32.mrb[14].mxu0  ;;  %v1643_v45 = vpop.f32.mrb[14].mxu1 }
 0x150   :  { %v1444_v46 = vpack.c.bf16 %v381_v38, %v381_v38  ;;  %1215 = vst.msk [vmem:[#allocation12 + $0x70] sm:$0xff] %vm1200_vm2, %v1002_v39  ;;  %v384_v47 = vadd.f32 %v1577_v44, %v2042_v36  ;;  %v1005_v48 = vadd.f32 %v1643_v45, %v2044_v37  ;;  %v375_v49 = vpop.f32.mrb[15].mxu0  ;;  %v996_v50 = vpop.f32.mrb[15].mxu1 }
 0x151   :  { %v1442_v51 = vpack.c.bf16 %v373_v42, %v373_v42  ;;  %1213 = vst.msk [vmem:[#allocation12 + $0x60] sm:$0xff] %vm1200_vm2, %v994_v43  ;;  %v376_v52 = vadd.f32 %v2042_v36, %v375_v49  ;;  %v997_v53 = vadd.f32 %v2044_v37, %v996_v50 }
 0x152   :  { %850 = vst.msk [vmem:[#allocation11 + $0x38] sm:$0xf] %vm835_vm3, %v1444_v46  ;;  %v1445_v54 = vpack.c.bf16 %v384_v47, %v384_v47 }
 0x153   :  { %1216 = vst.msk [vmem:[#allocation12 + $0x78] sm:$0xff] %vm1200_vm2, %v1005_v48  ;;  %v1443_v55 = vpack.c.bf16 %v376_v52, %v376_v52  ;;  %1214 = vst.msk [vmem:[#allocation12 + $0x68] sm:$0xff] %vm1200_vm2, %v997_v53 }
 0x154   :  { %848 = vst.msk [vmem:[#allocation11 + $0x30] sm:$0xf] %vm835_vm3, %v1442_v51  ;;  %851 = vst.msk [vmem:[#allocation11 + $0x3c] sm:$0xf] %vm835_vm3, %v1445_v54 }
 0x155   :  { %849 = vst.msk [vmem:[#allocation11 + $0x34] sm:$0xf] %vm835_vm3, %v1443_v55  ;;  %v1580_v56 = vpop.f32.mrb[16].mxu0  ;;  %v1646_v57 = vpop.f32.mrb[16].mxu1 }
 0x156   :  { %v397_v58 = vadd.f32 %v1580_v56, %v2042_v36  ;;  %v1018_v59 = vadd.f32 %v1646_v57, %v2044_v37  ;;  %v388_v60 = vpop.f32.mrb[17].mxu0  ;;  %v1009_v61 = vpop.f32.mrb[17].mxu1 }
 0x157   :  { %v389_v62 = vadd.f32 %v2042_v36, %v388_v60  ;;  %v1010_v63 = vadd.f32 %v2044_v37, %v1009_v61  ;;  %v1581_v0 = vpop.f32.mrb[18].mxu0  ;;  %v1647_v1 = vpop.f32.mrb[18].mxu1 }
 0x158   :  { %v1448_v2 = vpack.c.bf16 %v397_v58, %v397_v58  ;;  %1219 = vst.msk [vmem:[#allocation12 + $0x90] sm:$0xff] %vm1200_vm2, %v1018_v59  ;;  %v400_v3 = vadd.f32 %v1581_v0, %v2042_v36  ;;  %v1021_v4 = vadd.f32 %v1647_v1, %v2044_v37  ;;  %v391_v5 = vpop.f32.mrb[19].mxu0  ;;  %v1012_v6 = vpop.f32.mrb[19].mxu1 }
 0x159   :  { %v1446_v7 = vpack.c.bf16 %v389_v62, %v389_v62  ;;  %1217 = vst.msk [vmem:[#allocation12 + $0x80] sm:$0xff] %vm1200_vm2, %v1010_v63  ;;  %v392_v8 = vadd.f32 %v2042_v36, %v391_v5  ;;  %v1013_v9 = vadd.f32 %v2044_v37, %v1012_v6 }
 0x15a   :  { %854 = vst.msk [vmem:[#allocation11 + $0x48] sm:$0xf] %vm835_vm3, %v1448_v2  ;;  %v1449_v10 = vpack.c.bf16 %v400_v3, %v400_v3 }
 0x15b   :  { %1220 = vst.msk [vmem:[#allocation12 + $0x98] sm:$0xff] %vm1200_vm2, %v1021_v4  ;;  %v1447_v11 = vpack.c.bf16 %v392_v8, %v392_v8  ;;  %1218 = vst.msk [vmem:[#allocation12 + $0x88] sm:$0xff] %vm1200_vm2, %v1013_v9 }
 0x15c   :  { %852 = vst.msk [vmem:[#allocation11 + $0x40] sm:$0xf] %vm835_vm3, %v1446_v7  ;;  %855 = vst.msk [vmem:[#allocation11 + $0x4c] sm:$0xf] %vm835_vm3, %v1449_v10 }
 0x15d   :  { %853 = vst.msk [vmem:[#allocation11 + $0x44] sm:$0xf] %vm835_vm3, %v1447_v11  ;;  %v1584_v12 = vpop.f32.mrb[20].mxu0  ;;  %v1650_v13 = vpop.f32.mrb[20].mxu1 }
 0x15e   :  { %v413_v14 = vadd.f32 %v1584_v12, %v2042_v36  ;;  %v1034_v15 = vadd.f32 %v1650_v13, %v2044_v37  ;;  %v404_v16 = vpop.f32.mrb[21].mxu0  ;;  %v1025_v17 = vpop.f32.mrb[21].mxu1 }
 0x15f   :  { %v405_v18 = vadd.f32 %v2042_v36, %v404_v16  ;;  %v1026_v19 = vadd.f32 %v2044_v37, %v1025_v17  ;;  %v1585_v20 = vpop.f32.mrb[22].mxu0  ;;  %v1651_v21 = vpop.f32.mrb[22].mxu1 }
 0x160   :  { %v1452_v22 = vpack.c.bf16 %v413_v14, %v413_v14  ;;  %1223 = vst.msk [vmem:[#allocation12 + $0xb0] sm:$0xff] %vm1200_vm2, %v1034_v15  ;;  %v416_v23 = vadd.f32 %v1585_v20, %v2042_v36  ;;  %v1037_v24 = vadd.f32 %v1651_v21, %v2044_v37  ;;  %v407_v25 = vpop.f32.mrb[23].mxu0  ;;  %v1028_v26 = vpop.f32.mrb[23].mxu1 }
 0x161   :  { %v1450_v27 = vpack.c.bf16 %v405_v18, %v405_v18  ;;  %1221 = vst.msk [vmem:[#allocation12 + $0xa0] sm:$0xff] %vm1200_vm2, %v1026_v19  ;;  %v408_v28 = vadd.f32 %v2042_v36, %v407_v25  ;;  %v1029_v29 = vadd.f32 %v2044_v37, %v1028_v26 }
 0x162   :  { %858 = vst.msk [vmem:[#allocation11 + $0x58] sm:$0xf] %vm835_vm3, %v1452_v22  ;;  %v1453_v30 = vpack.c.bf16 %v416_v23, %v416_v23 }
 0x163   :  { %1224 = vst.msk [vmem:[#allocation12 + $0xb8] sm:$0xff] %vm1200_vm2, %v1037_v24  ;;  %v1451_v31 = vpack.c.bf16 %v408_v28, %v408_v28  ;;  %1222 = vst.msk [vmem:[#allocation12 + $0xa8] sm:$0xff] %vm1200_vm2, %v1029_v29 }
 0x164   :  { %856 = vst.msk [vmem:[#allocation11 + $0x50] sm:$0xf] %vm835_vm3, %v1450_v27  ;;  %859 = vst.msk [vmem:[#allocation11 + $0x5c] sm:$0xf] %vm835_vm3, %v1453_v30 }
 0x165   :  { %857 = vst.msk [vmem:[#allocation11 + $0x54] sm:$0xf] %vm835_vm3, %v1451_v31  ;;  %v1588_v32 = vpop.f32.mrb[24].mxu0  ;;  %v1654_v33 = vpop.f32.mrb[24].mxu1 }
 0x166   :  { %v429_v34 = vadd.f32 %v1588_v32, %v2042_v36  ;;  %v1050_v35 = vadd.f32 %v1654_v33, %v2044_v37  ;;  %v420_v38 = vpop.f32.mrb[25].mxu0  ;;  %v1041_v39 = vpop.f32.mrb[25].mxu1 }
 0x167   :  { %v421_v40 = vadd.f32 %v2042_v36, %v420_v38  ;;  %v1042_v41 = vadd.f32 %v2044_v37, %v1041_v39  ;;  %v1589_v42 = vpop.f32.mrb[26].mxu0  ;;  %v1655_v43 = vpop.f32.mrb[26].mxu1 }
 0x168   :  { %v1456_v44 = vpack.c.bf16 %v429_v34, %v429_v34  ;;  %1227 = vst.msk [vmem:[#allocation12 + $0xd0] sm:$0xff] %vm1200_vm2, %v1050_v35  ;;  %v432_v45 = vadd.f32 %v1589_v42, %v2042_v36  ;;  %v1053_v46 = vadd.f32 %v1655_v43, %v2044_v37  ;;  %v423_v47 = vpop.f32.mrb[27].mxu0  ;;  %v1044_v48 = vpop.f32.mrb[27].mxu1 }
 0x169   :  { %v1454_v49 = vpack.c.bf16 %v421_v40, %v421_v40  ;;  %1225 = vst.msk [vmem:[#allocation12 + $0xc0] sm:$0xff] %vm1200_vm2, %v1042_v41  ;;  %v424_v50 = vadd.f32 %v2042_v36, %v423_v47  ;;  %v1045_v51 = vadd.f32 %v2044_v37, %v1044_v48 }
 0x16a   :  { %862 = vst.msk [vmem:[#allocation11 + $0x68] sm:$0xf] %vm835_vm3, %v1456_v44  ;;  %v1457_v52 = vpack.c.bf16 %v432_v45, %v432_v45 }
 0x16b   :  { %1228 = vst.msk [vmem:[#allocation12 + $0xd8] sm:$0xff] %vm1200_vm2, %v1053_v46  ;;  %v1455_v53 = vpack.c.bf16 %v424_v50, %v424_v50  ;;  %1226 = vst.msk [vmem:[#allocation12 + $0xc8] sm:$0xff] %vm1200_vm2, %v1045_v51 }
 0x16c   :  { %860 = vst.msk [vmem:[#allocation11 + $0x60] sm:$0xf] %vm835_vm3, %v1454_v49  ;;  %863 = vst.msk [vmem:[#allocation11 + $0x6c] sm:$0xf] %vm835_vm3, %v1457_v52 }
 0x16d   :  { %861 = vst.msk [vmem:[#allocation11 + $0x64] sm:$0xf] %vm835_vm3, %v1455_v53  ;;  %v1592_v54 = vpop.f32.mrb[28].mxu0  ;;  %v1658_v55 = vpop.f32.mrb[28].mxu1 }
 0x16e   :  { %v445_v56 = vadd.f32 %v1592_v54, %v2042_v36  ;;  %v1066_v57 = vadd.f32 %v1658_v55, %v2044_v37  ;;  %v436_v58 = vpop.f32.mrb[29].mxu0  ;;  %v1057_v59 = vpop.f32.mrb[29].mxu1 }
 0x16f   :  { %v437_v60 = vadd.f32 %v2042_v36, %v436_v58  ;;  %v1058_v61 = vadd.f32 %v2044_v37, %v1057_v59  ;;  %v1593_v62 = vpop.f32.mrb[30].mxu0  ;;  %v1659_v63 = vpop.f32.mrb[30].mxu1 }
 0x170   :  { %v1460_v0 = vpack.c.bf16 %v445_v56, %v445_v56  ;;  %1231 = vst.msk [vmem:[#allocation12 + $0xf0] sm:$0xff] %vm1200_vm2, %v1066_v57  ;;  %v448_v1 = vadd.f32 %v1593_v62, %v2042_v36  ;;  %v1069_v2 = vadd.f32 %v1659_v63, %v2044_v37  ;;  %v439_v3 = vpop.f32.mrb[31].mxu0  ;;  %v1060_v4 = vpop.f32.mrb[31].mxu1 }
 0x171   :  { %v1458_v5 = vpack.c.bf16 %v437_v60, %v437_v60  ;;  %1229 = vst.msk [vmem:[#allocation12 + $0xe0] sm:$0xff] %vm1200_vm2, %v1058_v61  ;;  %v440_v6 = vadd.f32 %v2042_v36, %v439_v3  ;;  %v1061_v7 = vadd.f32 %v2044_v37, %v1060_v4 }
 0x172   :  { %866 = vst.msk [vmem:[#allocation11 + $0x78] sm:$0xf] %vm835_vm3, %v1460_v0  ;;  %v1461_v8 = vpack.c.bf16 %v448_v1, %v448_v1 }
 0x173   :  { %1232 = vst.msk [vmem:[#allocation12 + $0xf8] sm:$0xff] %vm1200_vm2, %v1069_v2  ;;  %v1459_v9 = vpack.c.bf16 %v440_v6, %v440_v6  ;;  %1230 = vst.msk [vmem:[#allocation12 + $0xe8] sm:$0xff] %vm1200_vm2, %v1061_v7 }
 0x174   :  { %864 = vst.msk [vmem:[#allocation11 + $0x70] sm:$0xf] %vm835_vm3, %v1458_v5  ;;  %867 = vst.msk [vmem:[#allocation11 + $0x7c] sm:$0xf] %vm835_vm3, %v1461_v8 }
 0x175   :  { %865 = vst.msk [vmem:[#allocation11 + $0x74] sm:$0xf] %vm835_vm3, %v1459_v9  ;;  %v1596_v10 = vpop.f32.mrb[32].mxu0  ;;  %v1662_v11 = vpop.f32.mrb[32].mxu1 }
 0x176   :  { %v461_v12 = vadd.f32 %v1596_v10, %v2042_v36  ;;  %v1082_v13 = vadd.f32 %v1662_v11, %v2044_v37  ;;  %v452_v14 = vpop.f32.mrb[33].mxu0  ;;  %v1073_v15 = vpop.f32.mrb[33].mxu1 }
 0x177   :  { %v453_v16 = vadd.f32 %v2042_v36, %v452_v14  ;;  %v1074_v17 = vadd.f32 %v2044_v37, %v1073_v15  ;;  %v1597_v18 = vpop.f32.mrb[34].mxu0  ;;  %v1663_v19 = vpop.f32.mrb[34].mxu1 }
 0x178   :  { %v1464_v20 = vpack.c.bf16 %v461_v12, %v461_v12  ;;  %1235 = vst.msk [vmem:[#allocation12 + $0x110] sm:$0xff] %vm1200_vm2, %v1082_v13  ;;  %v464_v21 = vadd.f32 %v1597_v18, %v2042_v36  ;;  %v1085_v22 = vadd.f32 %v1663_v19, %v2044_v37  ;;  %v455_v23 = vpop.f32.mrb[35].mxu0  ;;  %v1076_v24 = vpop.f32.mrb[35].mxu1 }
 0x179   :  { %v1462_v25 = vpack.c.bf16 %v453_v16, %v453_v16  ;;  %1233 = vst.msk [vmem:[#allocation12 + $0x100] sm:$0xff] %vm1200_vm2, %v1074_v17  ;;  %v456_v26 = vadd.f32 %v2042_v36, %v455_v23  ;;  %v1077_v27 = vadd.f32 %v2044_v37, %v1076_v24 }
 0x17a   :  { %870 = vst.msk [vmem:[#allocation11 + $0x88] sm:$0xf] %vm835_vm3, %v1464_v20  ;;  %v1465_v28 = vpack.c.bf16 %v464_v21, %v464_v21 }
 0x17b   :  { %1236 = vst.msk [vmem:[#allocation12 + $0x118] sm:$0xff] %vm1200_vm2, %v1085_v22  ;;  %v1463_v29 = vpack.c.bf16 %v456_v26, %v456_v26  ;;  %1234 = vst.msk [vmem:[#allocation12 + $0x108] sm:$0xff] %vm1200_vm2, %v1077_v27 }
 0x17c   :  { %868 = vst.msk [vmem:[#allocation11 + $0x80] sm:$0xf] %vm835_vm3, %v1462_v25  ;;  %871 = vst.msk [vmem:[#allocation11 + $0x8c] sm:$0xf] %vm835_vm3, %v1465_v28 }
 0x17d   :  { %869 = vst.msk [vmem:[#allocation11 + $0x84] sm:$0xf] %vm835_vm3, %v1463_v29  ;;  %v1600_v30 = vpop.f32.mrb[36].mxu0  ;;  %v1666_v31 = vpop.f32.mrb[36].mxu1 }
 0x17e   :  { %v477_v32 = vadd.f32 %v1600_v30, %v2042_v36  ;;  %v1098_v33 = vadd.f32 %v1666_v31, %v2044_v37  ;;  %v468_v34 = vpop.f32.mrb[37].mxu0  ;;  %v1089_v35 = vpop.f32.mrb[37].mxu1 }
 0x17f   :  { %v469_v38 = vadd.f32 %v2042_v36, %v468_v34  ;;  %v1090_v39 = vadd.f32 %v2044_v37, %v1089_v35  ;;  %v1601_v40 = vpop.f32.mrb[38].mxu0  ;;  %v1667_v41 = vpop.f32.mrb[38].mxu1 }
 0x180   :  { %v1468_v42 = vpack.c.bf16 %v477_v32, %v477_v32  ;;  %1239 = vst.msk [vmem:[#allocation12 + $0x130] sm:$0xff] %vm1200_vm2, %v1098_v33  ;;  %v480_v43 = vadd.f32 %v1601_v40, %v2042_v36  ;;  %v1101_v44 = vadd.f32 %v1667_v41, %v2044_v37  ;;  %v471_v45 = vpop.f32.mrb[39].mxu0  ;;  %v1092_v46 = vpop.f32.mrb[39].mxu1 }
 0x181   :  { %v1466_v47 = vpack.c.bf16 %v469_v38, %v469_v38  ;;  %1237 = vst.msk [vmem:[#allocation12 + $0x120] sm:$0xff] %vm1200_vm2, %v1090_v39  ;;  %v472_v48 = vadd.f32 %v2042_v36, %v471_v45  ;;  %v1093_v49 = vadd.f32 %v2044_v37, %v1092_v46 }
 0x182   :  { %874 = vst.msk [vmem:[#allocation11 + $0x98] sm:$0xf] %vm835_vm3, %v1468_v42  ;;  %v1469_v50 = vpack.c.bf16 %v480_v43, %v480_v43 }
 0x183   :  { %1240 = vst.msk [vmem:[#allocation12 + $0x138] sm:$0xff] %vm1200_vm2, %v1101_v44  ;;  %v1467_v51 = vpack.c.bf16 %v472_v48, %v472_v48  ;;  %1238 = vst.msk [vmem:[#allocation12 + $0x128] sm:$0xff] %vm1200_vm2, %v1093_v49 }
 0x184   :  { %872 = vst.msk [vmem:[#allocation11 + $0x90] sm:$0xf] %vm835_vm3, %v1466_v47  ;;  %875 = vst.msk [vmem:[#allocation11 + $0x9c] sm:$0xf] %vm835_vm3, %v1469_v50 }
 0x185   :  { %873 = vst.msk [vmem:[#allocation11 + $0x94] sm:$0xf] %vm835_vm3, %v1467_v51  ;;  %v1604_v52 = vpop.f32.mrb[40].mxu0  ;;  %v1670_v53 = vpop.f32.mrb[40].mxu1 }
 0x186   :  { %v493_v54 = vadd.f32 %v1604_v52, %v2042_v36  ;;  %v1114_v55 = vadd.f32 %v1670_v53, %v2044_v37  ;;  %v484_v56 = vpop.f32.mrb[41].mxu0  ;;  %v1105_v57 = vpop.f32.mrb[41].mxu1 }
 0x187   :  { %v485_v58 = vadd.f32 %v2042_v36, %v484_v56  ;;  %v1106_v59 = vadd.f32 %v2044_v37, %v1105_v57  ;;  %v1605_v60 = vpop.f32.mrb[42].mxu0  ;;  %v1671_v61 = vpop.f32.mrb[42].mxu1 }
 0x188   :  { %v1472_v62 = vpack.c.bf16 %v493_v54, %v493_v54  ;;  %1243 = vst.msk [vmem:[#allocation12 + $0x150] sm:$0xff] %vm1200_vm2, %v1114_v55  ;;  %v496_v63 = vadd.f32 %v1605_v60, %v2042_v36  ;;  %v1117_v0 = vadd.f32 %v1671_v61, %v2044_v37  ;;  %v487_v1 = vpop.f32.mrb[43].mxu0  ;;  %v1108_v2 = vpop.f32.mrb[43].mxu1 }
 0x189   :  { %v1470_v3 = vpack.c.bf16 %v485_v58, %v485_v58  ;;  %1241 = vst.msk [vmem:[#allocation12 + $0x140] sm:$0xff] %vm1200_vm2, %v1106_v59  ;;  %v488_v4 = vadd.f32 %v2042_v36, %v487_v1  ;;  %v1109_v5 = vadd.f32 %v2044_v37, %v1108_v2 }
 0x18a   :  { %878 = vst.msk [vmem:[#allocation11 + $0xa8] sm:$0xf] %vm835_vm3, %v1472_v62  ;;  %v1473_v6 = vpack.c.bf16 %v496_v63, %v496_v63 }
 0x18b   :  { %1244 = vst.msk [vmem:[#allocation12 + $0x158] sm:$0xff] %vm1200_vm2, %v1117_v0  ;;  %v1471_v7 = vpack.c.bf16 %v488_v4, %v488_v4  ;;  %1242 = vst.msk [vmem:[#allocation12 + $0x148] sm:$0xff] %vm1200_vm2, %v1109_v5 }
 0x18c   :  { %876 = vst.msk [vmem:[#allocation11 + $0xa0] sm:$0xf] %vm835_vm3, %v1470_v3  ;;  %879 = vst.msk [vmem:[#allocation11 + $0xac] sm:$0xf] %vm835_vm3, %v1473_v6 }
 0x18d   :  { %877 = vst.msk [vmem:[#allocation11 + $0xa4] sm:$0xf] %vm835_vm3, %v1471_v7  ;;  %v1608_v8 = vpop.f32.mrb[44].mxu0  ;;  %v1674_v9 = vpop.f32.mrb[44].mxu1 }
 0x18e   :  { %v509_v10 = vadd.f32 %v1608_v8, %v2042_v36  ;;  %v1130_v11 = vadd.f32 %v1674_v9, %v2044_v37  ;;  %v500_v12 = vpop.f32.mrb[45].mxu0  ;;  %v1121_v13 = vpop.f32.mrb[45].mxu1 }
 0x18f   :  { %v501_v14 = vadd.f32 %v2042_v36, %v500_v12  ;;  %v1122_v15 = vadd.f32 %v2044_v37, %v1121_v13  ;;  %v1609_v16 = vpop.f32.mrb[46].mxu0  ;;  %v1675_v17 = vpop.f32.mrb[46].mxu1 }
 0x190   :  { %v1476_v18 = vpack.c.bf16 %v509_v10, %v509_v10  ;;  %1247 = vst.msk [vmem:[#allocation12 + $0x170] sm:$0xff] %vm1200_vm2, %v1130_v11  ;;  %v512_v19 = vadd.f32 %v1609_v16, %v2042_v36  ;;  %v1133_v20 = vadd.f32 %v1675_v17, %v2044_v37  ;;  %v503_v21 = vpop.f32.mrb[47].mxu0  ;;  %v1124_v22 = vpop.f32.mrb[47].mxu1 }
 0x191   :  { %v1474_v23 = vpack.c.bf16 %v501_v14, %v501_v14  ;;  %1245 = vst.msk [vmem:[#allocation12 + $0x160] sm:$0xff] %vm1200_vm2, %v1122_v15  ;;  %v504_v24 = vadd.f32 %v2042_v36, %v503_v21  ;;  %v1125_v25 = vadd.f32 %v2044_v37, %v1124_v22 }
 0x192   :  { %882 = vst.msk [vmem:[#allocation11 + $0xb8] sm:$0xf] %vm835_vm3, %v1476_v18  ;;  %v1477_v26 = vpack.c.bf16 %v512_v19, %v512_v19 }
 0x193   :  { %1248 = vst.msk [vmem:[#allocation12 + $0x178] sm:$0xff] %vm1200_vm2, %v1133_v20  ;;  %v1475_v27 = vpack.c.bf16 %v504_v24, %v504_v24  ;;  %1246 = vst.msk [vmem:[#allocation12 + $0x168] sm:$0xff] %vm1200_vm2, %v1125_v25 }
 0x194   :  { %880 = vst.msk [vmem:[#allocation11 + $0xb0] sm:$0xf] %vm835_vm3, %v1474_v23  ;;  %883 = vst.msk [vmem:[#allocation11 + $0xbc] sm:$0xf] %vm835_vm3, %v1477_v26 }
 0x195   :  { %881 = vst.msk [vmem:[#allocation11 + $0xb4] sm:$0xf] %vm835_vm3, %v1475_v27  ;;  %v1612_v28 = vpop.f32.mrb[48].mxu0  ;;  %v1678_v29 = vpop.f32.mrb[48].mxu1 }
 0x196   :  { %v525_v30 = vadd.f32 %v1612_v28, %v2042_v36  ;;  %v1146_v31 = vadd.f32 %v1678_v29, %v2044_v37  ;;  %v516_v32 = vpop.f32.mrb[49].mxu0  ;;  %v1137_v33 = vpop.f32.mrb[49].mxu1 }
 0x197   :  { %v517_v34 = vadd.f32 %v2042_v36, %v516_v32  ;;  %v1138_v35 = vadd.f32 %v2044_v37, %v1137_v33  ;;  %v1613_v38 = vpop.f32.mrb[50].mxu0  ;;  %v1679_v39 = vpop.f32.mrb[50].mxu1 }
 0x198   :  { %v1480_v40 = vpack.c.bf16 %v525_v30, %v525_v30  ;;  %1251 = vst.msk [vmem:[#allocation12 + $0x190] sm:$0xff] %vm1200_vm2, %v1146_v31  ;;  %v528_v41 = vadd.f32 %v1613_v38, %v2042_v36  ;;  %v1149_v42 = vadd.f32 %v1679_v39, %v2044_v37  ;;  %v519_v43 = vpop.f32.mrb[51].mxu0  ;;  %v1140_v44 = vpop.f32.mrb[51].mxu1 }
 0x199   :  { %v1478_v45 = vpack.c.bf16 %v517_v34, %v517_v34  ;;  %1249 = vst.msk [vmem:[#allocation12 + $0x180] sm:$0xff] %vm1200_vm2, %v1138_v35  ;;  %v520_v46 = vadd.f32 %v2042_v36, %v519_v43  ;;  %v1141_v47 = vadd.f32 %v2044_v37, %v1140_v44 }
 0x19a   :  { %886 = vst.msk [vmem:[#allocation11 + $0xc8] sm:$0xf] %vm835_vm3, %v1480_v40  ;;  %v1481_v48 = vpack.c.bf16 %v528_v41, %v528_v41 }
 0x19b   :  { %1252 = vst.msk [vmem:[#allocation12 + $0x198] sm:$0xff] %vm1200_vm2, %v1149_v42  ;;  %v1479_v49 = vpack.c.bf16 %v520_v46, %v520_v46  ;;  %1250 = vst.msk [vmem:[#allocation12 + $0x188] sm:$0xff] %vm1200_vm2, %v1141_v47 }
 0x19c   :  { %884 = vst.msk [vmem:[#allocation11 + $0xc0] sm:$0xf] %vm835_vm3, %v1478_v45  ;;  %887 = vst.msk [vmem:[#allocation11 + $0xcc] sm:$0xf] %vm835_vm3, %v1481_v48 }
 0x19d   :  { %885 = vst.msk [vmem:[#allocation11 + $0xc4] sm:$0xf] %vm835_vm3, %v1479_v49  ;;  %v1616_v50 = vpop.f32.mrb[52].mxu0  ;;  %v1682_v51 = vpop.f32.mrb[52].mxu1 }
 0x19e   :  { %v541_v52 = vadd.f32 %v1616_v50, %v2042_v36  ;;  %v1162_v53 = vadd.f32 %v1682_v51, %v2044_v37  ;;  %v532_v54 = vpop.f32.mrb[53].mxu0  ;;  %v1153_v55 = vpop.f32.mrb[53].mxu1 }
 0x19f   :  { %v533_v56 = vadd.f32 %v2042_v36, %v532_v54  ;;  %v1154_v57 = vadd.f32 %v2044_v37, %v1153_v55  ;;  %v1617_v58 = vpop.f32.mrb[54].mxu0  ;;  %v1683_v59 = vpop.f32.mrb[54].mxu1 }
 0x1a0   :  { %v1484_v60 = vpack.c.bf16 %v541_v52, %v541_v52  ;;  %1255 = vst.msk [vmem:[#allocation12 + $0x1b0] sm:$0xff] %vm1200_vm2, %v1162_v53  ;;  %v544_v61 = vadd.f32 %v1617_v58, %v2042_v36  ;;  %v1165_v62 = vadd.f32 %v1683_v59, %v2044_v37  ;;  %v535_v63 = vpop.f32.mrb[55].mxu0  ;;  %v1156_v0 = vpop.f32.mrb[55].mxu1 }
 0x1a1   :  { %v1482_v1 = vpack.c.bf16 %v533_v56, %v533_v56  ;;  %1253 = vst.msk [vmem:[#allocation12 + $0x1a0] sm:$0xff] %vm1200_vm2, %v1154_v57  ;;  %v536_v2 = vadd.f32 %v2042_v36, %v535_v63  ;;  %v1157_v3 = vadd.f32 %v2044_v37, %v1156_v0 }
 0x1a2   :  { %890 = vst.msk [vmem:[#allocation11 + $0xd8] sm:$0xf] %vm835_vm3, %v1484_v60  ;;  %v1485_v4 = vpack.c.bf16 %v544_v61, %v544_v61 }
 0x1a3   :  { %1256 = vst.msk [vmem:[#allocation12 + $0x1b8] sm:$0xff] %vm1200_vm2, %v1165_v62  ;;  %v1483_v5 = vpack.c.bf16 %v536_v2, %v536_v2  ;;  %1254 = vst.msk [vmem:[#allocation12 + $0x1a8] sm:$0xff] %vm1200_vm2, %v1157_v3 }
 0x1a4   :  { %888 = vst.msk [vmem:[#allocation11 + $0xd0] sm:$0xf] %vm835_vm3, %v1482_v1  ;;  %891 = vst.msk [vmem:[#allocation11 + $0xdc] sm:$0xf] %vm835_vm3, %v1485_v4 }
 0x1a5   :  { %889 = vst.msk [vmem:[#allocation11 + $0xd4] sm:$0xf] %vm835_vm3, %v1483_v5  ;;  %v1620_v6 = vpop.f32.mrb[56].mxu0  ;;  %v1686_v7 = vpop.f32.mrb[56].mxu1 }
 0x1a6   :  { %v557_v8 = vadd.f32 %v1620_v6, %v2042_v36  ;;  %v1178_v9 = vadd.f32 %v1686_v7, %v2044_v37  ;;  %v548_v10 = vpop.f32.mrb[57].mxu0  ;;  %v1169_v11 = vpop.f32.mrb[57].mxu1 }
 0x1a7   :  { %v549_v12 = vadd.f32 %v2042_v36, %v548_v10  ;;  %v1170_v13 = vadd.f32 %v2044_v37, %v1169_v11  ;;  %v1621_v14 = vpop.f32.mrb[58].mxu0  ;;  %v1687_v15 = vpop.f32.mrb[58].mxu1 }
 0x1a8   :  { %v1488_v16 = vpack.c.bf16 %v557_v8, %v557_v8  ;;  %1259 = vst.msk [vmem:[#allocation12 + $0x1d0] sm:$0xff] %vm1200_vm2, %v1178_v9  ;;  %v560_v17 = vadd.f32 %v1621_v14, %v2042_v36  ;;  %v1181_v18 = vadd.f32 %v1687_v15, %v2044_v37  ;;  %v551_v19 = vpop.f32.mrb[59].mxu0  ;;  %v1172_v20 = vpop.f32.mrb[59].mxu1 }
 0x1a9   :  { %v1486_v21 = vpack.c.bf16 %v549_v12, %v549_v12  ;;  %1257 = vst.msk [vmem:[#allocation12 + $0x1c0] sm:$0xff] %vm1200_vm2, %v1170_v13  ;;  %v552_v22 = vadd.f32 %v2042_v36, %v551_v19  ;;  %v1173_v23 = vadd.f32 %v2044_v37, %v1172_v20 }
 0x1aa   :  { %894 = vst.msk [vmem:[#allocation11 + $0xe8] sm:$0xf] %vm835_vm3, %v1488_v16  ;;  %v1489_v24 = vpack.c.bf16 %v560_v17, %v560_v17 }
 0x1ab   :  { %1260 = vst.msk [vmem:[#allocation12 + $0x1d8] sm:$0xff] %vm1200_vm2, %v1181_v18  ;;  %v1487_v25 = vpack.c.bf16 %v552_v22, %v552_v22  ;;  %1258 = vst.msk [vmem:[#allocation12 + $0x1c8] sm:$0xff] %vm1200_vm2, %v1173_v23 }
 0x1ac   :  { %892 = vst.msk [vmem:[#allocation11 + $0xe0] sm:$0xf] %vm835_vm3, %v1486_v21  ;;  %895 = vst.msk [vmem:[#allocation11 + $0xec] sm:$0xf] %vm835_vm3, %v1489_v24 }
 0x1ad   :  { %893 = vst.msk [vmem:[#allocation11 + $0xe4] sm:$0xf] %vm835_vm3, %v1487_v25  ;;  %v1624_v26 = vpop.f32.mrb[60].mxu0  ;;  %v1690_v27 = vpop.f32.mrb[60].mxu1 }
 0x1ae   :  { %v573_v28 = vadd.f32 %v1624_v26, %v2042_v36  ;;  %v1194_v29 = vadd.f32 %v1690_v27, %v2044_v37  ;;  %v564_v30 = vpop.f32.mrb[61].mxu0  ;;  %v1185_v31 = vpop.f32.mrb[61].mxu1 }
 0x1af   :  { %v565_v32 = vadd.f32 %v2042_v36, %v564_v30  ;;  %v1186_v33 = vadd.f32 %v2044_v37, %v1185_v31  ;;  %v1625_v34 = vpop.f32.mrb[62].mxu0  ;;  %v1691_v35 = vpop.f32.mrb[62].mxu1 }
 0x1b0   :  { %v1492_v38 = vpack.c.bf16 %v573_v28, %v573_v28  ;;  %1263 = vst.msk [vmem:[#allocation12 + $0x1f0] sm:$0xff] %vm1200_vm2, %v1194_v29  ;;  %v576_v39 = vadd.f32 %v1625_v34, %v2042_v36  ;;  %v1197_v40 = vadd.f32 %v1691_v35, %v2044_v37  ;;  %v567_v41 = vpop.f32.mrb[63].mxu0  ;;  %v1188_v42 = vpop.f32.mrb[63].mxu1 }
 0x1b1   :  { %v1490_v43 = vpack.c.bf16 %v565_v32, %v565_v32  ;;  %1261 = vst.msk [vmem:[#allocation12 + $0x1e0] sm:$0xff] %vm1200_vm2, %v1186_v33  ;;  %v568_v44 = vadd.f32 %v2042_v36, %v567_v41  ;;  %v1189_v45 = vadd.f32 %v2044_v37, %v1188_v42 }
 0x1b2   :  { %898 = vst.msk [vmem:[#allocation11 + $0xf8] sm:$0xf] %vm835_vm3, %v1492_v38  ;;  %v1493_v46 = vpack.c.bf16 %v576_v39, %v576_v39 }
 0x1b3   :  { %1264 = vst.msk [vmem:[#allocation12 + $0x1f8] sm:$0xff] %vm1200_vm2, %v1197_v40  ;;  %v1491_v47 = vpack.c.bf16 %v568_v44, %v568_v44  ;;  %1262 = vst.msk [vmem:[#allocation12 + $0x1e8] sm:$0xff] %vm1200_vm2, %v1189_v45 }
 0x1b4   :  { %896 = vst.msk [vmem:[#allocation11 + $0xf0] sm:$0xf] %vm835_vm3, %v1490_v43  ;;  %899 = vst.msk [vmem:[#allocation11 + $0xfc] sm:$0xf] %vm835_vm3, %v1493_v46 }
 0x1b5   :  { %1826 = shalt.err (!%p1823_p2)
}
 0x1b6   :  { %s1827_s15 = scalar_lea.hbm %s2342_s6, 8192 }
 0x1b7   :  { %p1828_p3 = scmp.ne.s32.totalorder %s2342_s6, %s1827_s15  ;;  %p1831_p4 = scmp.lt.u32.totalorder %s1827_s15, %s2342_s6 }
 0x1b9   :  { %p1833_p5 = pnand %p1831_p4, %p1828_p3 }
 0x1bb   :  { %1836 = shalt.err (!%p1833_p5)
}
 0x1bc   :  { %1288 = dma.vmem_to_hbm [thread:$0]  %s1283_s9, 8192, %s2342_s6, [#allocation13], %s1872_s3, %s1872_s3, %s1873_s24   ;;  %897 = vst.msk [vmem:[#allocation11 + $0xf4] sm:$0xf] %vm835_vm3, %v1491_v47 }
 0x1bd   :  { %s1837_s20 = scalar_lea.vmem %s2298_s11, 4096  ;;  %p1842_p7 = scmp.lt.s32.totalorder %s2298_s11, %s2298_s11 }
 0x1be   :  { %p1838_p6 = scmp.ne.s32.totalorder %s2298_s11, %s1837_s20  ;;  %p1843_p8 = scmp.lt.s32.totalorder %s1837_s20, %s1837_s20 }
 0x1c0   :  { %p1844_p9 = por %p1843_p8, %p1842_p7 }
 0x1c2   :  { %p1845_p10 = pnand %p1844_p9, %p1838_p6 }
 0x1c4   :  { %1848 = shalt.err (!%p1845_p10)
}
 0x1c5   :  { %s1849_s23 = scalar_lea.hbm %s2341_s5, 4096 }
 0x1c6   :  { %p1850_p11 = scmp.ne.s32.totalorder %s2341_s5, %s1849_s23  ;;  %p1853_p12 = scmp.lt.u32.totalorder %s1849_s23, %s2341_s5 }
 0x1c8   :  { %p1855_p13 = pnand %p1853_p12, %p1850_p11 }
 0x1ca   :  { %1858 = shalt.err (!%p1855_p13)
}
 0x1cb   :  { %s1878_s3 = smov 64   ;;  %s1879_s24 = smov 4  }
 0x1cc   :  { %1276 = dma.vmem_to_hbm [thread:$0]  %s2298_s11, 4096, %s2341_s5, [#allocation4], %s1878_s3, %s1878_s3, %s1879_s24  }
 0x1cd   :  { %1865 = dma.done.wait [#allocation4], 4096  }
 0x1ce   :  { %1866 = vsyncadd [#allocation4], 4294963200 }
 0x1cf   :  { %1867 = dma.done.wait [#allocation13], 8192  }
 0x1d0   :  { %1868 = vsyncadd [#allocation13], 4294959104 }
 0x1d1   :  { %1295 = vsyncpa [#allocation3], 1 }
 0x1d2   :  { %1296 = vsyncpa [#allocation6], 1 }
 0x1d3   :  { %1297 = vsyncpa [#allocation9], 1 }
 0x1d4   :  { %1298 = vsyncpa [#allocation4], 1 }
 0x1d5   :  { %1299 = vsyncpa [#allocation13], 1 }

</bundles_post_ra>
